<compile_context>
chip_gen: v7x
topology: tpu7x:2x2x1
jax: 0.10.0
libtpu: 0.0.40
codegen_flags: <defaults>
</compile_context>

<pallas_src>
import jax
import jax.numpy as jnp
from jax.experimental import pallas as pl
from jax.experimental.pallas import tpu as pltpu


TILE = 1024  # batch points (lanes) per grid step
H1 = 50      # hidden width, layer 1
H2 = 50      # hidden width, layer 2


def wave_pinn_kernel(x_ref, y_ref, t_ref,
                     w1_ref, b1_ref, w2_ref, b2_ref, w3_ref, b3_ref,
                     out_ref):
    """Fused 3-layer MLP on a (1, TILE) slab of collocation points.

    Shapes (feature-major):
      x/y/t : (1, T)      w1: (50, 3)  b1: (50, 1)
      h1/h2 : (50, T)     w2: (50, 50) b2: (50, 1)
      out   : (1, T)      w3: (1, 50)  b3: (1, 1)
    """
    w1 = w1_ref[...]                                            # (50, 3)

    # Layer 1: K=3 -> three broadcast VPU FMAs (keeps the MXU off this path).
    z1 = (w1[:, 0:1] * x_ref[...]
          + w1[:, 1:2] * y_ref[...]
          + w1[:, 2:3] * t_ref[...]
          + b1_ref[...])                                        # (50, T)
    h1 = jnp.tanh(z1)                                           # EUP

    # Layer 2: (50,50) @ (50,T) on the MXU, f32 accumulate.
    z2 = jnp.dot(w2_ref[...], h1,
                 preferred_element_type=jnp.float32) + b2_ref[...]
    h2 = jnp.tanh(z2)                                           # (50, T)

    # Layer 3: (1,50) @ (50,T) -> lane-dense (1,T) output row.
    out_ref[...] = (jnp.dot(w3_ref[...], h2,
                            preferred_element_type=jnp.float32)
                    + b3_ref[...])


def wave_pinn_forward(x, y, t, params, *, tile=TILE):
    """x, y, t: (N, 1) float32.  Returns (N, 1) float32."""
    n = x.shape[0]
    w1, b1, w2, b2, w3, b3 = params

    # Feature-major (transposed) weights / biases for the W^T @ X kernel.
    w1t, w2t, w3t = w1.T, w2.T, w3.T            # (50,3), (50,50), (1,50)
    b1t, b2t, b3t = b1.T, b2.T, b3.T            # (50,1), (50,1), (1,1)

    # Batch-on-lanes rows, padded to a whole number of tiles.
    n_blocks = pl.cdiv(n, tile)
    n_pad = n_blocks * tile

    def as_row(v):
        r = v.reshape(1, n)
        if n_pad != n:
            r = jnp.pad(r, ((0, 0), (0, n_pad - n)))
        return r

    xr, yr, tr = as_row(x), as_row(y), as_row(t)

    row_spec = pl.BlockSpec((1, tile), lambda i: (0, i))

    def resident(shape):
        # Same block index every grid step -> DMA'd once, stays in VMEM.
        return pl.BlockSpec(shape, lambda i: (0, 0))

    weight_bytes = 4 * (H1 * 3 + H1 + H2 * H1 + H2 + H2 + 1)
    cost = pl.CostEstimate(
        flops=2 * n * (3 * H1 + H1 * H2 + H2 * 1),
        transcendentals=(H1 + H2) * n,
        bytes_accessed=16 * n + weight_bytes,
    )

    out = pl.pallas_call(
        wave_pinn_kernel,
        out_shape=jax.ShapeDtypeStruct((1, n_pad), jnp.float32),
        grid=(n_blocks,),
        in_specs=[
            row_spec, row_spec, row_spec,           # x, y, t tiles
            resident((H1, 3)), resident((H1, 1)),   # W1^T, b1
            resident((H2, H1)), resident((H2, 1)),  # W2^T, b2
            resident((1, H2)), resident((1, 1)),    # W3^T, b3
        ],
        out_specs=row_spec,
        compiler_params=pltpu.CompilerParams(
            dimension_semantics=("parallel",)),     # megacore on v7x
        cost_estimate=cost,
    )(xr, yr, tr, w1t, b1t, w2t, b2t, w3t, b3t)

    return out[:, :n].reshape(n, 1)


def init_params(key):
    """Match PyTorch nn.Linear default init: U(-k, k), k = 1/sqrt(fan_in)."""
    def linear(key, fan_in, fan_out):
        kw, kb = jax.random.split(key)
        bound = 1.0 / jnp.sqrt(float(fan_in))
        # Stored as (fan_in, fan_out); transposed inside the wrapper.
        w = jax.random.uniform(kw, (fan_in, fan_out), jnp.float32, -bound, bound)
        b = jax.random.uniform(kb, (1, fan_out), jnp.float32, -bound, bound)
        return w, b

    k1, k2, k3 = jax.random.split(key, 3)
    w1, b1 = linear(k1, 3, H1)
    w2, b2 = linear(k2, H1, H2)
    w3, b3 = linear(k3, H2, 1)
    return (w1, b1, w2, b2, w3, b3)


def reference_forward(x, y, t, params):
    """Pure-JAX reference for correctness checking."""
    w1, b1, w2, b2, w3, b3 = params
    inp = jnp.concatenate([x, y, t], axis=1)
    h1 = jnp.tanh(inp @ w1 + b1)
    h2 = jnp.tanh(h1 @ w2 + b2)
    return h2 @ w3 + b3


if __name__ == "__main__":
    key = jax.random.PRNGKey(0)
    kx, ky, kt, kp = jax.random.split(key, 4)

    # Non-multiple of TILE so the padding path and a multi-step grid are
    # exercised (grid = 2 blocks of 1024 lanes).
    N = 1037
    x = jax.random.uniform(kx, (N, 1), jnp.float32)
    y = jax.random.uniform(ky, (N, 1), jnp.float32)
    t = jax.random.uniform(kt, (N, 1), jnp.float32)

    params = init_params(kp)

    out = wave_pinn_forward(x, y, t, params)
    out = jax.block_until_ready(out)

    ref = reference_forward(x, y, t, params)
    assert out.shape == (N, 1), out.shape
    max_err = jnp.max(jnp.abs(out - ref))
    assert jnp.allclose(out, ref, atol=5e-5, rtol=5e-5), (
        f"mismatch: max abs err {max_err}")

    print("KERNEL_OK")
</pallas_src>

<mosaic_0001>
module attributes {stable_mosaic.version = 11 : i64} {
  func.func @wave_pinn_kernel(%arg0: i32, %arg1: memref<1x1024xf32, #tpu.memory_space<vmem>>, %arg2: memref<1x1024xf32, #tpu.memory_space<vmem>>, %arg3: memref<1x1024xf32, #tpu.memory_space<vmem>>, %arg4: memref<50x3xf32, #tpu.memory_space<vmem>>, %arg5: memref<50x1xf32, #tpu.memory_space<vmem>>, %arg6: memref<50x50xf32, #tpu.memory_space<vmem>>, %arg7: memref<50x1xf32, #tpu.memory_space<vmem>>, %arg8: memref<1x50xf32, #tpu.memory_space<vmem>>, %arg9: memref<1x1xf32, #tpu.memory_space<vmem>>, %arg10: memref<1x1024xf32, #tpu.memory_space<vmem>>) attributes {dimension_semantics = [#tpu.dimension_semantics<parallel>], iteration_bounds = array<i64: 2>, scalar_prefetch = 0 : i64, scratch_operands = 0 : i64, tpu.core_type = #tpu.core_type<tc>, window_params = [{transform_indices = @transform_0, window_bounds = array<i64: 1, 1024>}, {transform_indices = @transform_1, window_bounds = array<i64: 1, 1024>}, {transform_indices = @transform_2, window_bounds = array<i64: 1, 1024>}, {pipeline_mode = #tpu.pipeline_mode<synchronous>, transform_indices = @transform_3, window_bounds = array<i64: 50, 3>}, {pipeline_mode = #tpu.pipeline_mode<synchronous>, transform_indices = @transform_4, window_bounds = array<i64: 50, 1>}, {pipeline_mode = #tpu.pipeline_mode<synchronous>, transform_indices = @transform_5, window_bounds = array<i64: 50, 50>}, {pipeline_mode = #tpu.pipeline_mode<synchronous>, transform_indices = @transform_6, window_bounds = array<i64: 50, 1>}, {pipeline_mode = #tpu.pipeline_mode<synchronous>, transform_indices = @transform_7, window_bounds = array<i64: 1, 50>}, {pipeline_mode = #tpu.pipeline_mode<synchronous>, transform_indices = @transform_8, window_bounds = array<i64: 1, 1>}, {transform_indices = @transform_9, window_bounds = array<i64: 1, 1024>}]} {
    %c0 = arith.constant 0 : index
    %c0_0 = arith.constant 0 : index
    %0 = vector.load %arg4[%c0, %c0_0] : memref<50x3xf32, #tpu.memory_space<vmem>>, vector<50x3xf32>
    %1 = vector.extract_strided_slice %0 {offsets = [0, 0], sizes = [50, 1], strides = [1, 1]} : vector<50x3xf32> to vector<50x1xf32>
    %c0_1 = arith.constant 0 : index
    %c0_2 = arith.constant 0 : index
    %2 = vector.load %arg1[%c0_1, %c0_2] : memref<1x1024xf32, #tpu.memory_space<vmem>>, vector<1x1024xf32>
    %3 = vector.broadcast %1 : vector<50x1xf32> to vector<50x1024xf32>
    %4 = vector.broadcast %2 : vector<1x1024xf32> to vector<50x1024xf32>
    %5 = arith.mulf %3, %4 : vector<50x1024xf32>
    %6 = vector.extract_strided_slice %0 {offsets = [0, 1], sizes = [50, 1], strides = [1, 1]} : vector<50x3xf32> to vector<50x1xf32>
    %c0_3 = arith.constant 0 : index
    %c0_4 = arith.constant 0 : index
    %7 = vector.load %arg2[%c0_3, %c0_4] : memref<1x1024xf32, #tpu.memory_space<vmem>>, vector<1x1024xf32>
    %8 = vector.broadcast %6 : vector<50x1xf32> to vector<50x1024xf32>
    %9 = vector.broadcast %7 : vector<1x1024xf32> to vector<50x1024xf32>
    %10 = arith.mulf %8, %9 : vector<50x1024xf32>
    %11 = arith.addf %5, %10 : vector<50x1024xf32>
    %12 = vector.extract_strided_slice %0 {offsets = [0, 2], sizes = [50, 1], strides = [1, 1]} : vector<50x3xf32> to vector<50x1xf32>
    %c0_5 = arith.constant 0 : index
    %c0_6 = arith.constant 0 : index
    %13 = vector.load %arg3[%c0_5, %c0_6] : memref<1x1024xf32, #tpu.memory_space<vmem>>, vector<1x1024xf32>
    %14 = vector.broadcast %12 : vector<50x1xf32> to vector<50x1024xf32>
    %15 = vector.broadcast %13 : vector<1x1024xf32> to vector<50x1024xf32>
    %16 = arith.mulf %14, %15 : vector<50x1024xf32>
    %17 = arith.addf %11, %16 : vector<50x1024xf32>
    %c0_7 = arith.constant 0 : index
    %c0_8 = arith.constant 0 : index
    %18 = vector.load %arg5[%c0_7, %c0_8] : memref<50x1xf32, #tpu.memory_space<vmem>>, vector<50x1xf32>
    %19 = vector.broadcast %18 : vector<50x1xf32> to vector<50x1024xf32>
    %20 = arith.addf %17, %19 : vector<50x1024xf32>
    %21 = math.tanh %20 : vector<50x1024xf32>
    %c0_9 = arith.constant 0 : index
    %c0_10 = arith.constant 0 : index
    %22 = vector.load %arg6[%c0_9, %c0_10] : memref<50x50xf32, #tpu.memory_space<vmem>>, vector<50x50xf32>
    %cst = arith.constant dense<0.000000e+00> : vector<50x1024xf32>
    %23 = tpu.matmul %22, %21, %cst {dimension_numbers = #tpu.dot_dimension_numbers<[1], [0], [0], [1], [0, 0, 1, 1], [], []>} : vector<50x50xf32>, vector<50x1024xf32>, vector<50x1024xf32> -> vector<50x1024xf32>
    %c0_11 = arith.constant 0 : index
    %c0_12 = arith.constant 0 : index
    %24 = vector.load %arg7[%c0_11, %c0_12] : memref<50x1xf32, #tpu.memory_space<vmem>>, vector<50x1xf32>
    %25 = vector.broadcast %24 : vector<50x1xf32> to vector<50x1024xf32>
    %26 = arith.addf %23, %25 : vector<50x1024xf32>
    %27 = math.tanh %26 : vector<50x1024xf32>
    %c0_13 = arith.constant 0 : index
    %c0_14 = arith.constant 0 : index
    %28 = vector.load %arg8[%c0_13, %c0_14] : memref<1x50xf32, #tpu.memory_space<vmem>>, vector<1x50xf32>
    %cst_15 = arith.constant dense<0.000000e+00> : vector<1x1024xf32>
    %29 = tpu.matmul %28, %27, %cst_15 {dimension_numbers = #tpu.dot_dimension_numbers<[1], [0], [0], [1], [0, 0, 1, 1], [], []>} : vector<1x50xf32>, vector<50x1024xf32>, vector<1x1024xf32> -> vector<1x1024xf32>
    %c0_16 = arith.constant 0 : index
    %c0_17 = arith.constant 0 : index
    %30 = vector.load %arg9[%c0_16, %c0_17] : memref<1x1xf32, #tpu.memory_space<vmem>>, vector<1x1xf32>
    %31 = vector.broadcast %30 : vector<1x1xf32> to vector<1x1024xf32>
    %32 = arith.addf %29, %31 : vector<1x1024xf32>
    %c0_18 = arith.constant 0 : index
    %c0_19 = arith.constant 0 : index
    %33 = vector.load %arg10[%c0_18, %c0_19] : memref<1x1024xf32, #tpu.memory_space<vmem>>, vector<1x1024xf32>
    tpu.vector_store %arg10[%c0_18, %c0_19], %32 {strides = array<i32>} : memref<1x1024xf32, #tpu.memory_space<vmem>>, vector<1x1024xf32>,
    return
  }
  func.func @transform_0(%arg0: i32) -> (i32, i32) {
    %c0_i32 = arith.constant 0 : i32
    %c0_i32_0 = arith.constant 0 : i32
    return %c0_i32, %arg0 : i32, i32
  }
  func.func @transform_1(%arg0: i32) -> (i32, i32) {
    %c0_i32 = arith.constant 0 : i32
    %c0_i32_0 = arith.constant 0 : i32
    return %c0_i32, %arg0 : i32, i32
  }
  func.func @transform_2(%arg0: i32) -> (i32, i32) {
    %c0_i32 = arith.constant 0 : i32
    %c0_i32_0 = arith.constant 0 : i32
    return %c0_i32, %arg0 : i32, i32
  }
  func.func @transform_3(%arg0: i32) -> (i32, i32) {
    %c0_i32 = arith.constant 0 : i32
    %c0_i32_0 = arith.constant 0 : i32
    %c0_i32_1 = arith.constant 0 : i32
    return %c0_i32, %c0_i32_0 : i32, i32
  }
  func.func @transform_4(%arg0: i32) -> (i32, i32) {
    %c0_i32 = arith.constant 0 : i32
    %c0_i32_0 = arith.constant 0 : i32
    %c0_i32_1 = arith.constant 0 : i32
    return %c0_i32, %c0_i32_0 : i32, i32
  }
  func.func @transform_5(%arg0: i32) -> (i32, i32) {
    %c0_i32 = arith.constant 0 : i32
    %c0_i32_0 = arith.constant 0 : i32
    %c0_i32_1 = arith.constant 0 : i32
    return %c0_i32, %c0_i32_0 : i32, i32
  }
  func.func @transform_6(%arg0: i32) -> (i32, i32) {
    %c0_i32 = arith.constant 0 : i32
    %c0_i32_0 = arith.constant 0 : i32
    %c0_i32_1 = arith.constant 0 : i32
    return %c0_i32, %c0_i32_0 : i32, i32
  }
  func.func @transform_7(%arg0: i32) -> (i32, i32) {
    %c0_i32 = arith.constant 0 : i32
    %c0_i32_0 = arith.constant 0 : i32
    %c0_i32_1 = arith.constant 0 : i32
    return %c0_i32, %c0_i32_0 : i32, i32
  }
  func.func @transform_8(%arg0: i32) -> (i32, i32) {
    %c0_i32 = arith.constant 0 : i32
    %c0_i32_0 = arith.constant 0 : i32
    %c0_i32_1 = arith.constant 0 : i32
    return %c0_i32, %c0_i32_0 : i32, i32
  }
  func.func @transform_9(%arg0: i32) -> (i32, i32) {
    %c0_i32 = arith.constant 0 : i32
    %c0_i32_0 = arith.constant 0 : i32
    return %c0_i32, %arg0 : i32, i32
  }
}

</mosaic_0001>

<bundles_post_ra>
// kernel: tpu_custom_call.1
= control target key start
LH: loop header
LB: loop body
LE: loop exit
PB: predicated region body
PF: predicated region fallthrough
CT: control target
= control target key end

     0   :  { %s3843_s0 = inlined_call_operand.vmem [shape: f32[1,2048], index: 0, kind: input, shape index: {}]   ;;  %s3844_s1 = inlined_call_operand.vmem [shape: f32[1,2048], index: 1, kind: input, shape index: {}]   ;;  %s3845_s2 = inlined_call_operand.vmem [shape: f32[1,2048], index: 2, kind: input, shape index: {}]   ;;  %s3846_s3 = inlined_call_operand.vmem [shape: f32[50,3], index: 3, kind: input, shape index: {}]   ;;  %s3847_s4 = inlined_call_operand.vmem [shape: f32[50,1], index: 4, kind: input, shape index: {}]   ;;  %s3848_s5 = inlined_call_operand.vmem [shape: f32[50,50], index: 5, kind: input, shape index: {}]   ;;  %s3849_s6 = inlined_call_operand.vmem [shape: f32[50,1], index: 6, kind: input, shape index: {}]   ;;  %s3850_s7 = inlined_call_operand.vmem [shape: f32[1,50], index: 7, kind: input, shape index: {}]   ;;  %s3851_s8 = inlined_call_operand.<no memory space> [shape: f32[1,1], index: 8, kind: input, shape index: {}]   ;;  %s3852_s9 = inlined_call_operand.hbm [shape: f32[1,2048], index: 9, kind: output, shape index: {}]  }
   0x1   :  { %v14_v0 = vstv %s3851_s8 }
   0x2   :  { %15 = vst [vmem:[#allocation2] sm:$0x1] %v14_v0 }
   0x3   :  { %16 = vsyncpa [#allocation4], 0 }
   0x4   :  { %18 = vsyncpa [#allocation4 + $0x1], 0  ;;  %s2644_s11 = smov 0   ;;  %s2646_s12 = smov 0  }
   0x5   :  { %s2648_s13 = smov 0   ;;  %s2650_s14 = smov 0  }
   0x6 LB: > { %s2665_s8 = sadd.s32 4294967295, %s2583_s14   ;;  %s2079_s15 = sadd.s32 4294967294, %s2583_s14   ;;  %s2583_s14 = sphi %s2650_s14, %s4017_s14   ;;  %s2579_s13 = sphi %s2648_s13, %s4016_s13   ;;  %s2575_s12 = sphi %s2646_s12, %s4015_s12   ;;  %s2571_s11 = sphi %s2644_s11, %s4014_s11  }
   0x7   : > { %s2669_s16 = sadd.s32 1, %s2583_s14   ;;  %s235_s17 = sadd.s32 1, %s2579_s13 }
   0x8   : > { %s232_s18 = ssub.s32 %s2583_s14, %s2669_s16  ;;  %p245_p0 = scmp.ne.s32.totalorder %s2579_s13, %s2575_s12 }
   0x9   : > { %p233_p1 = scmp.eq.s32.totalorder %s232_s18, 0  ;;  %p246_p2 = scmp.eq.s32.totalorder %s2665_s8, 1 }
   0xa   : > { %p251_p3 = scmp.ne.s32.totalorder %s2575_s12, %s2571_s11  ;;  %p252_p4 = scmp.eq.s32.totalorder %s2079_s15, 1 }
   0xb   : > { %s2680_s19 = scalar_select %p233_p1, %s2579_s13, %s235_s17  }
   0xc   : > { %p2682_p5 = por %p246_p2, %p245_p0  ;;  %p2686_p6 = por %p252_p4, %p251_p3 }
   0xd   : > { %p2082_p7 = scmp.ge.s32.totalorder %s2583_s14, 1  ;;  %p312_p8 = scmp.lt.s32.totalorder %s2583_s14, 3 }
   0xf   : > { %p313_p9 = pnand %p2082_p7, %p312_p8 }
  0x11   : > { %316 = sbr.rel (%p313_p9) target bundleno = 785 (0x311), region = 56 }
  0x18   : > { %v375_v1 = vld [vmem:[%s3846_s3 + $0x20] sm:$0xff]  ;;  %v2585_v3 = vmov 1   ;;  %v372_v4 = vld [vmem:[%s3846_s3 + $0x8] sm:$0xff]  ;;  %v2586_v5 = vmov 2   ;;  %v373_v6 = vld [vmem:[%s3846_s3 + $0x10] sm:$0xff]  ;;  %v2587_v8 = vmov 0   ;;  %v415_v23 = vlaneseq }
  0x19   : > { %v371_v2 = vld [vmem:[%s3846_s3] sm:$0xff]  ;;  %2287 = vset.pattern.permute.xlu0 %v2585_v3  ;;  %2281 = vset.pattern.permute.xlu1 %v2585_v3  ;;  %v376_v7 = vld [vmem:[%s3846_s3 + $0x28] sm:$0xff]  ;;  %v374_v9 = vld [vmem:[%s3846_s3 + $0x18] sm:$0xff]  ;;  %v3853_v22 = vmov 0.0   ;;  %s2084_s30 = sshll.u32 %s2665_s8, 3  ;;  %vm1100_vm0 = vcmask 1041408  }
  0x1a   : > { %529 = vperm.xlu0 %2287, %v375_v1   ;;  %513 = vperm.xlu1 %2281, %v371_v2   ;;  %v876_v10 = vld [vmem:[%s3847_s4 + $0x8] sm:$0xff]  ;;  %v875_v11 = vld [vmem:[%s3847_s4] sm:$0xff]  ;;  %v377_v12 = vld [vmem:[%s3846_s3 + $0x30] sm:$0x3]  ;;  %p356_p10 = scmp.lt.s32.totalorder %s2084_s30, 15  ;;  %v2748_v26 = vshrl.u32 %v415_v23, 7 }
  0x1b   : > { %v880_v13 = vld [vmem:[%s3847_s4 + $0x28] sm:$0xff]  ;;  %v881_v14 = vld [vmem:[%s3847_s4 + $0x30] sm:$0x3]  ;;  %v1039_v16 = vld [vmem:[%s3849_s6 + $0x18] sm:$0xff]  ;;  %1189 = vmatprep.mubr.f32.mxu0 %v3853_v22  ;;  %1296 = vmatprep.mubr.f32.mxu1 %v3853_v22  ;;  %vm1078_vm1 = vcmask 408576   ;;  %s352_s25 = sand.u32 1, %s2575_s12  }
  0x1c   : > { %v1037_v15 = vld [vmem:[%s3849_s6 + $0x8] sm:$0xff]  ;;  %v877_v18 = vld [vmem:[%s3847_s4 + $0x10] sm:$0xff]  ;;  %v1610_v19 = vld [vmem:[#allocation2] sm:$0x1]  ;;  %s4019_s30 = smov (!%p356_p10, %s2084_s30), 15  ;;  %3883 = vst [vmem:[#allocation6_spill] sm:$0xff] %v2748_v26 }
  0x1d   : > { %v1041_v17 = vld [vmem:[%s3849_s6 + $0x28] sm:$0xff]  ;;  %v878_v20 = vld [vmem:[%s3847_s4 + $0x18] sm:$0xff]  ;;  %v879_v21 = vld [vmem:[%s3847_s4 + $0x20] sm:$0xff]  ;;  %s363_s17 = scalar_lea.vmem %s3844_s1, %s4019_s30  ;;  %v433_v28 = vsub.s32 4, %v2748_v26  ;;  %v437_v29 = vsub.s32 5, %v2748_v26  ;;  %v441_v30 = vsub.s32 6, %v2748_v26  ;;  %s368_s23 = scalar_lea.vmem %s3845_s2, %s4019_s30 }
  0x1e   : > { %2288 = vset.pattern.permute.xlu0 %v2586_v5  ;;  %517 = vperm.xlu1 %2281, %v372_v4   ;;  %v445_v31 = vsub.s32 7, %v2748_v26  ;;  %s358_s26 = scalar_lea.vmem %s3843_s0, %s4019_s30  ;;  %v511_v33 = vld [vmem:[%s363_s17] sm:$0xff]  ;;  %v2768_v34 = vsub.s32 0, %v2748_v26  ;;  %v421_v35 = vsub.s32 1, %v2748_v26  ;;  %v425_v36 = vsub.s32 2, %v2748_v26  ;;  %s2140_s27 = sshll.u32 %s2665_s8, 7 }
  0x1f   : > { %695 = vperm.xlu0 %2288, %v371_v2   ;;  %v429_v37 = vsub.s32 3, %v2748_v26  ;;  %v693_v38 = vld [vmem:[%s368_s23] sm:$0xff]  ;;  %v2773_v40 = vrot.slane %v511_v33, %v433_v28  ;;  %v2775_v41 = vrot.slane %v511_v33, %v437_v29  ;;  %v2777_v42 = vrot.slane %v511_v33, %v441_v30  ;;  %s3801_s15 = scalar_lea.hbm %s3852_s9, %s2140_s27  ;;  %s1991_s17 = scalar_lea.sflag [#allocation4], %s352_s25 }
  0x20   : > { %3884 = vst [vmem:[#allocation7_spill] sm:$0xff] %v2768_v34  ;;  %v378_v39 = vld [vmem:[%s358_s26] sm:$0xff]  ;;  %v2779_v43 = vrot.slane %v511_v33, %v445_v31  ;;  %v2786_v46 = vrot.slane %v511_v33, %v2768_v34  ;;  %v2788_v47 = vrot.slane %v511_v33, %v421_v35  ;;  %v2790_v48 = vrot.slane %v511_v33, %v425_v36  ;;  %s2083_s26 = sshll.u32 %s352_s25, 3  ;;  %s2590_s8 = smov [#allocation3]  }
  0x21   : > { %3885 = vst [vmem:[#allocation8_spill] sm:$0xff] %v2773_v40  ;;  %3886 = vst [vmem:[#allocation9_spill] sm:$0xff] %v2775_v41  ;;  %v2792_v49 = vrot.slane %v511_v33, %v429_v37  ;;  %v2794_v50 = vrot.slane %v693_v38, %v433_v28  ;;  %v2796_v51 = vrot.slane %v693_v38, %v441_v30  ;;  %s354_s28 = scalar_lea.vmem [#allocation3], %s2083_s26  ;;  %s2525_s22 = sshll.u32 %s2590_s8, 4  ;;  %s2526_s22 = int_to_ptr.vmem [resolvable:$false] %s2525_s22 }
  0x22   : > { %2282 = vset.pattern.permute.xlu1 %v2586_v5  ;;  %3887 = vst [vmem:[#allocation10_spill] sm:$0xff] %v2777_v42  ;;  %3888 = vst [vmem:[#allocation11_spill] sm:$0xff] %v2779_v43  ;;  %v2799_v52 = vrot.slane %v378_v39, %v2768_v34  ;;  %v2801_v53 = vrot.slane %v378_v39, %v421_v35  ;;  %v2803_v54 = vrot.slane %v378_v39, %v425_v36  ;;  %s2005_s29 = sshll.u32 %s354_s28, 4  ;;  %s2527_s23 = scalar_lea.vmem %s2526_s22, 256  ;;  %s3803_s29 = int_to_ptr.vmem [resolvable:$true] %s2005_s29 }
  0x23   : > { %703 = vperm.xlu0 %2288, %v373_v6   ;;  %699 = vperm.xlu1 %2282, %v372_v4   ;;  %3889 = vst [vmem:[#allocation12_spill] sm:$0xff] %v2794_v50  ;;  %3890 = vst [vmem:[#allocation13_spill] sm:$0xff] %v2796_v51  ;;  %v2805_v55 = vrot.slane %v378_v39, %v429_v37  ;;  %v2807_v56 = vrot.slane %v378_v39, %v433_v28  ;;  %s2521_s18 = scalar_lea.vmem %s3803_s29, 128  ;;  %p2528_p0 = scmp.lt.s32.totalorder %s3803_s29, %s2526_s22 }
  0x24   : > { %v2809_v57 = vrot.slane %v378_v39, %v437_v29  ;;  %v2813_v59 = vrot.slane %v378_v39, %v441_v30  ;;  %v2815_v60 = vrot.slane %v378_v39, %v445_v31  ;;  %v2817_v61 = vrot.slane %v693_v38, %v421_v35  ;;  %p2522_p11 = scmp.ne.s32.totalorder %s3803_s29, %s2521_s18  ;;  %p2529_p1 = scmp.lt.s32.totalorder %s2527_s23, %s2521_s18 }
  0x25   : > { %3891 = vst [vmem:[#allocation14_spill] sm:$0xff] %v2807_v56  ;;  %v2819_v62 = vrot.slane %v693_v38, %v429_v37  ;;  %v2824_v0 = vrot.slane %v693_v38, %v2768_v34 }
  0x26   : > { %p2523_p12 = pnand %p2522_p11, %p2682_p5  ;;  %p2530_p2 = por %p2529_p1, %p2528_p0 }
  0x27   : > { %715 = vperm.xlu0 %2288, %v376_v7   ;;  %2283 = vset.pattern.permute.xlu1 %v2587_v8 }
  0x28   : > { %391 = vperm.xlu1 %2283, %v373_v6   ;;  %p2524_p13 = pneg %p2523_p12 }
  0x2a   : > { %p2531_p3 = pnand %p2530_p2, %p2524_p13 }
  0x2b   : > { %2291 = vset.pattern.permute.xlu0 %v2587_v8 }
  0x2c   : > { %381 = vperm.xlu0 %2291, %v371_v2   ;;  %2284 = vset.pattern.permute.xlu1 %v2585_v3  ;;  %v2828_v2 = vrot.slane %v693_v38, %v437_v29 }
  0x2d   : > { %521 = vperm.xlu1 %2284, %v373_v6  }
  0x2e   : > { %3892 = vst [vmem:[#allocation15_spill] sm:$0xff] %v2828_v2 }
  0x30   : > { %386 = vperm.xlu0 %2291, %v372_v4  }
  0x31   : > { %525 = vperm.xlu1 %2284, %v374_v9  }
  0x34   : > { %396 = vperm.xlu0 %2291, %v374_v9  }
  0x35   : > { %2285 = vset.pattern.permute.xlu1 %v2586_v5 }
  0x36   : > { %707 = vperm.xlu1 %2285, %v374_v9  }
  0x38   : > { %889 = vperm.xlu0 %2291, %v876_v10  }
  0x3a   : > { %2286 = vset.pattern.permute.xlu1 %v2587_v8 }
  0x3b   : > { %884 = vperm.xlu1 %2286, %v875_v11  }
  0x3c   : > { %411 = vperm.xlu0 %2291, %v377_v12  }
  0x3f   : > { %401 = vperm.xlu1 %2286, %v375_v1  }
  0x40   : > { %909 = vperm.xlu0 %2291, %v880_v13  }
  0x43   : > { %406 = vperm.xlu1 %2286, %v376_v7  }
  0x44   : > { %914 = vperm.xlu0 %2291, %v881_v14  }
  0x47   : > { %2289 = vset.pattern.permute.xlu1 %v2585_v3 }
  0x48   : > { %1050 = vperm.xlu0 %2291, %v1037_v15   ;;  %533 = vperm.xlu1 %2289, %v376_v7  }
  0x4c   : > { %1060 = vperm.xlu0 %2291, %v1039_v16   ;;  %2290 = vset.pattern.permute.xlu1 %v2586_v5 }
  0x4d   : > { %711 = vperm.xlu1 %2290, %v375_v1   ;;  %v2826_v1 = vrot.slane %v693_v38, %v425_v36 }
  0x50   : > { %1070 = vperm.xlu0 %2291, %v1041_v17  }
  0x51   : > { %2292 = vset.pattern.permute.xlu1 %v2587_v8 }
  0x52   : > { %894 = vperm.xlu1 %2292, %v877_v18  }
  0x54   : > { %1613 = vperm.xlu0 %2291, %v1610_v19  }
  0x56   : > { %899 = vperm.xlu1 %2292, %v878_v20  }
  0x5a   : > { %2293 = vset.pattern.permute.xlu1 %v2585_v3  ;;  %v2830_v3 = vrot.slane %v693_v38, %v445_v31 }
  0x5b   : > { %537 = vperm.xlu1 %2293, %v377_v12  }
  0x5c   : > { %3893 = vst [vmem:[#allocation16_spill] sm:$0xff] %v2830_v3 }
  0x5f   : > { %2294 = vset.pattern.permute.xlu1 %v2587_v8 }
  0x60   : > { %904 = vperm.xlu1 %2294, %v879_v21  }
  0x64   : > { %2295 = vset.pattern.permute.xlu1 %v2586_v5 }
  0x65   : > { %719 = vperm.xlu1 %2295, %v377_v12  }
  0x69   : > { %2296 = vset.pattern.permute.xlu1 %v2587_v8 }
  0x99   : > { %v2746_v24 = vpop.permute.xlu1 %513  ;;  %v530_v25 = vpop.permute.xlu0 %529 }
  0x9a   : > { %v585_v4 = vmul.f32 %v2773_v40, %v2746_v24  ;;  %v2836_v5 = vmul.f32 %v2775_v41, %v2746_v24  ;;  %v587_v6 = vmul.f32 %v2777_v42, %v2746_v24  ;;  %v2842_v7 = vmul.f32 %v2779_v43, %v2746_v24 }
  0x9b   : > { %v2845_v8 = vmul.f32 %v2786_v46, %v530_v25  ;;  %v2848_v9 = vmul.f32 %v2788_v47, %v530_v25  ;;  %v2851_v10 = vmul.f32 %v2790_v48, %v530_v25  ;;  %v2854_v11 = vmul.f32 %v2792_v49, %v530_v25 }
  0x9c   : > { %3894 = vst [vmem:[#allocation17_spill] sm:$0xff] %v2836_v5  ;;  %3895 = vst [vmem:[#allocation18_spill] sm:$0xff] %v2842_v7  ;;  %v2857_v12 = vmul.f32 %v2773_v40, %v530_v25  ;;  %v2860_v13 = vmul.f32 %v2775_v41, %v530_v25  ;;  %v2863_v14 = vmul.f32 %v2777_v42, %v530_v25 }
  0x9d   : > { %v2753_v27 = vpop.permute.xlu1 %517  ;;  %3896 = vst [vmem:[#allocation19_spill] sm:$0xff] %v2845_v8  ;;  %3897 = vst [vmem:[#allocation20_spill] sm:$0xff] %v2848_v9  ;;  %v2866_v15 = vmul.f32 %v2779_v43, %v530_v25  ;;  %v582_v17 = vmul.f32 %v2788_v47, %v2746_v24  ;;  %v584_v18 = vmul.f32 %v2792_v49, %v2746_v24 }
  0x9e   : > { %v2759_v32 = vpop.permute.xlu0 %695  ;;  %3898 = vst [vmem:[#allocation21_spill] sm:$0xff] %v2851_v10  ;;  %3899 = vst [vmem:[#allocation22_spill] sm:$0xff] %v2854_v11  ;;  %v2876_v19 = vmul.f32 %v2786_v46, %v2746_v24  ;;  %v2880_v20 = vmul.f32 %v2790_v48, %v2746_v24  ;;  %v2884_v21 = vmul.f32 %v2773_v40, %v2753_v27 }
  0x9f   : > { %3900 = vst [vmem:[#allocation23_spill] sm:$0xff] %v2860_v13  ;;  %3901 = vst [vmem:[#allocation24_spill] sm:$0xff] %v2866_v15  ;;  %v2888_v23 = vmul.f32 %v2775_v41, %v2753_v27  ;;  %v2898_v24 = vmul.f32 %v2777_v42, %v2753_v27  ;;  %v2902_v30 = vmul.f32 %v2779_v43, %v2753_v27 }
  0xa0   : > { %v2906_v31 = vmul.f32 %v2794_v50, %v2759_v32  ;;  %v2910_v33 = vmul.f32 %v2796_v51, %v2759_v32  ;;  %v590_v34 = vmul.f32 %v2788_v47, %v2753_v27  ;;  %v766_v13 = vmul.f32 %v2819_v62, %v2759_v32 }
  0xa1   : > { %3902 = vst [vmem:[#allocation25_spill] sm:$0xff] %v2888_v23  ;;  %3903 = vst [vmem:[#allocation26_spill] sm:$0xff] %v2902_v30  ;;  %v2940_v15 = vmul.f32 %v2786_v46, %v2753_v27  ;;  %v2946_v8 = vmul.f32 %v2824_v0, %v2759_v32 }
  0xa2   : > { %v2781_v44 = vpop.permute.xlu1 %699  ;;  %v2783_v45 = vpop.permute.xlu0 %703  ;;  %3904 = vst [vmem:[#allocation27_spill] sm:$0xff] %v2906_v31  ;;  %3905 = vst [vmem:[#allocation28_spill] sm:$0xff] %v2910_v33 }
  0xa3   : > { %v2976_v33 = vmul.f32 %v2794_v50, %v2783_v45  ;;  %v772_v31 = vmul.f32 %v2817_v61, %v2781_v44  ;;  %v3012_v7 = vmul.f32 %v2817_v61, %v2783_v45 }
  0xa5   : > { %3914 = vst [vmem:[#allocation37_spill] sm:$0xff] %v2976_v33  ;;  %v2996_v33 = vmul.f32 %v2826_v1, %v2781_v44  ;;  %3918 = vst [vmem:[#allocation41_spill] sm:$0xff] %v3012_v7  ;;  %v3032_v7 = vmul.f32 %v2826_v1, %v2783_v45 }
  0xa6   : > { %v2811_v58 = vpop.permute.xlu0 %715 }
  0xa7   : > { %v2821_v63 = vpop.permute.xlu1 %391  ;;  %3922 = vst [vmem:[#allocation45_spill] sm:$0xff] %v3032_v7 }
  0xa8   : > { %v475_v35 = vmul.f32 %v2807_v56, %v2821_v63  ;;  %v477_v39 = vmul.f32 %v2813_v59, %v2821_v63 }
  0xab   : > { %v2868_v16 = vpop.permute.xlu0 %381 }
  0xac   : > { %v459_v25 = vmul.f32 %v2807_v56, %v2868_v16  ;;  %v461_v28 = vmul.f32 %v2813_v59, %v2868_v16  ;;  %v2894_v29 = vpop.permute.xlu1 %521 }
  0xad   : > { %v601_v38 = vmul.f32 %v2773_v40, %v2894_v29  ;;  %v603_v22 = vmul.f32 %v2777_v42, %v2894_v29 }
  0xae   : > { %v2914_v36 = vadd.f32 %v585_v4, %v459_v25  ;;  %v2916_v37 = vadd.f32 %v587_v6, %v461_v28  ;;  %v764_v4 = vmul.f32 %v2817_v61, %v2759_v32  ;;  %v592_v28 = vmul.f32 %v2792_v49, %v2753_v27 }
  0xaf   : > { %v2924_v26 = vpop.permute.xlu0 %386  ;;  %v2930_v25 = vadd.f32 %v601_v38, %v475_v35  ;;  %v2942_v10 = vadd.f32 %v603_v22, %v477_v39  ;;  %v2950_v35 = vmul.f32 %v2790_v48, %v2753_v27  ;;  %v2954_v38 = vmul.f32 %v2826_v1, %v2759_v32 }
  0xb0   : > { %3906 = vst [vmem:[#allocation29_spill] sm:$0xff] %v2914_v36  ;;  %3907 = vst [vmem:[#allocation30_spill] sm:$0xff] %v2916_v37  ;;  %v2932_v6 = vpop.permute.xlu1 %525  ;;  %v456_v22 = vmul.f32 %v2801_v53, %v2868_v16  ;;  %v2964_v39 = vmul.f32 %v2828_v2, %v2759_v32  ;;  %v2972_v27 = vmul.f32 %v2796_v51, %v2781_v44 }
  0xb1   : > { %3908 = vst [vmem:[#allocation31_spill] sm:$0xff] %v2930_v25  ;;  %3909 = vst [vmem:[#allocation32_spill] sm:$0xff] %v2942_v10  ;;  %v2958_v25 = vmul.f32 %v2794_v50, %v2781_v44  ;;  %v2968_v10 = vmul.f32 %v2830_v3, %v2759_v32  ;;  %v2980_v37 = vmul.f32 %v2796_v51, %v2783_v45 }
  0xb2   : > { %3911 = vst [vmem:[#allocation34_spill] sm:$0xff] %v2964_v39  ;;  %3913 = vst [vmem:[#allocation36_spill] sm:$0xff] %v2972_v27  ;;  %v458_v32 = vmul.f32 %v2805_v55, %v2868_v16  ;;  %v774_v36 = vmul.f32 %v2819_v62, %v2781_v44  ;;  %v2992_v27 = vmul.f32 %v2824_v0, %v2781_v44 }
  0xb3   : > { %3910 = vst [vmem:[#allocation33_spill] sm:$0xff] %v2958_v25  ;;  %3912 = vst [vmem:[#allocation35_spill] sm:$0xff] %v2968_v10  ;;  %v2982_v25 = vpop.permute.xlu0 %396  ;;  %v611_v10 = vmul.f32 %v2777_v42, %v2932_v6  ;;  %v464_v23 = vmul.f32 %v2801_v53, %v2924_v26  ;;  %v638_v39 = vadd.f32 %v582_v17, %v456_v22 }
  0xb4   : > { %3915 = vst [vmem:[#allocation38_spill] sm:$0xff] %v2980_v37  ;;  %3916 = vst [vmem:[#allocation39_spill] sm:$0xff] %v2982_v25  ;;  %v609_v37 = vmul.f32 %v2773_v40, %v2932_v6  ;;  %v483_v30 = vmul.f32 %v2807_v56, %v2982_v25  ;;  %v485_v11 = vmul.f32 %v2813_v59, %v2982_v25 }
  0xb5   : > { %v3006_v9 = vpop.permute.xlu1 %707  ;;  %v3016_v40 = vmul.f32 %v2819_v62, %v2783_v45  ;;  %v466_v25 = vmul.f32 %v2805_v55, %v2924_v26  ;;  %v646_v17 = vadd.f32 %v590_v34, %v464_v23  ;;  %v455_v22 = vmul.f32 %v2799_v52, %v2868_v16 }
  0xb6   : > { %3917 = vst [vmem:[#allocation40_spill] sm:$0xff] %v3006_v9  ;;  %v3018_v42 = vadd.f32 %v609_v37, %v483_v30  ;;  %v3020_v5 = vadd.f32 %v611_v10, %v485_v11  ;;  %v3026_v9 = vmul.f32 %v2824_v0, %v2783_v45  ;;  %v3036_v30 = vmul.f32 %v2828_v2, %v2781_v44 }
  0xb7   : > { %v820_v10 = vadd.f32 %v764_v4, %v638_v39  ;;  %v640_v11 = vadd.f32 %v584_v18, %v458_v32  ;;  %v3040_v37 = vmul.f32 %v2830_v3, %v2781_v44  ;;  %v3044_v34 = vmul.f32 %v2828_v2, %v2783_v45  ;;  %v3064_v4 = vpop.permute.xlu0 %889 }
  0xb8   : > { %3919 = vst [vmem:[#allocation42_spill] sm:$0xff] %v3018_v42  ;;  %3920 = vst [vmem:[#allocation43_spill] sm:$0xff] %v3020_v5  ;;  %v3048_v23 = vmul.f32 %v2794_v50, %v2811_v58  ;;  %v3052_v5 = vmul.f32 %v2796_v51, %v2811_v58  ;;  %v3058_v18 = vmul.f32 %v2817_v61, %v2811_v58 }
  0xb9   : > { %3921 = vst [vmem:[#allocation44_spill] sm:$0xff] %v3026_v9  ;;  %3923 = vst [vmem:[#allocation46_spill] sm:$0xff] %v3036_v30  ;;  %v3062_v44 = vmul.f32 %v2830_v3, %v2783_v45  ;;  %v648_v32 = vadd.f32 %v592_v28, %v466_v25  ;;  %v637_v45 = vadd.f32 %v2876_v19, %v455_v22  ;;  %v1036_v25 = vld [vmem:[%s3849_s6] sm:$0xff] }
  0xba   : > { %3924 = vst [vmem:[#allocation47_spill] sm:$0xff] %v3040_v37  ;;  %3925 = vst [vmem:[#allocation48_spill] sm:$0xff] %v3044_v34  ;;  %v3054_v42 = vpop.permute.xlu1 %884  ;;  %v3075_v34 = vmul.f32 %v2799_v52, %v2821_v63  ;;  %v828_v37 = vadd.f32 %v772_v31, %v646_v17  ;;  %v3085_v28 = vmul.f32 %v2801_v53, %v2821_v63  ;;  %1045 = vperm.xlu1 %2296, %v1036_v25  }
  0xbb   : > { %3926 = vst [vmem:[#allocation49_spill] sm:$0xff] %v3048_v23  ;;  %3927 = vst [vmem:[#allocation50_spill] sm:$0xff] %v3052_v5  ;;  %v918_v39 = vadd.f32 %v3054_v42, %v820_v10  ;;  %v463_v23 = vmul.f32 %v2799_v52, %v2924_v26  ;;  %v3071_v5 = vmul.f32 %v2819_v62, %v2811_v58 }
  0xbc   : > { %3928 = vst [vmem:[#allocation51_spill] sm:$0xff] %v3054_v42  ;;  %3929 = vst [vmem:[#allocation52_spill] sm:$0xff] %v3058_v18  ;;  %v3089_v10 = vmul.f32 %v2803_v54, %v2821_v63  ;;  %v822_v30 = vadd.f32 %v766_v13, %v640_v11  ;;  %v465_v31 = vmul.f32 %v2803_v54, %v2924_v26  ;;  %v1038_v11 = vld [vmem:[%s3849_s6 + $0x10] sm:$0xff] }
  0xbd   : > { %3930 = vst [vmem:[#allocation53_spill] sm:$0xff] %v3062_v44  ;;  %3931 = vst [vmem:[#allocation54_spill] sm:$0xff] %v3064_v4  ;;  %v457_v44 = vmul.f32 %v2803_v54, %v2868_v16  ;;  %v3095_v19 = vmul.f32 %v2805_v55, %v2821_v63  ;;  %v3099_v17 = vmul.f32 %v2809_v57, %v2821_v63  ;;  %2297 = vtanh.f32 %v918_v39 }
  0xbe   : > { %3932 = vst [vmem:[#allocation55_spill] sm:$0xff] %v3071_v5  ;;  %v3103_v22 = vmul.f32 %v2815_v60, %v2821_v63  ;;  %v3105_v5 = vpop.permute.xlu1 %401  ;;  %v926_v13 = vadd.f32 %v3064_v4, %v828_v37  ;;  %v830_v25 = vadd.f32 %v774_v36, %v648_v32  ;;  %v920_v18 = vadd.f32 %v3054_v42, %v822_v30 }
  0xbf   : > { %3933 = vst [vmem:[#allocation56_spill] sm:$0xff] %v3099_v17  ;;  %v645_v7 = vadd.f32 %v2940_v15, %v463_v23  ;;  %v491_v17 = vmul.f32 %v2807_v56, %v3105_v5  ;;  %v493_v63 = vmul.f32 %v2813_v59, %v3105_v5  ;;  %v639_v37 = vadd.f32 %v2880_v20, %v457_v44 }
  0xc0   : > { %3934 = vst [vmem:[#allocation57_spill] sm:$0xff] %v3103_v22  ;;  %v819_v22 = vadd.f32 %v2946_v8, %v637_v45  ;;  %2299 = vtanh.f32 %v926_v13  ;;  %v928_v9 = vadd.f32 %v3064_v4, %v830_v25  ;;  %v647_v39 = vadd.f32 %v2950_v35, %v465_v31  ;;  %1055 = vperm.xlu1 %2296, %v1038_v11   ;;  %v1040_v35 = vld [vmem:[%s3849_s6 + $0x20] sm:$0xff] }
  0xc1   : > { %v3123_v36 = vmul.f32 %v2824_v0, %v2811_v58  ;;  %v3126_v15 = vadd.f32 %v2857_v12, %v491_v17  ;;  %v3129_v30 = vadd.f32 %v2863_v14, %v493_v63  ;;  %v3136_v20 = vmul.f32 %v2826_v1, %v2811_v58 }
  0xc2   : > { %v3131_v23 = vpop.permute.xlu1 %406  ;;  %v917_v8 = vadd.f32 %v3054_v42, %v819_v22  ;;  %2301 = vtanh.f32 %v920_v18  ;;  %v827_v44 = vadd.f32 %v2992_v27, %v645_v7  ;;  %v3144_v12 = vmul.f32 %v2828_v2, %v2811_v58 }
  0xc3   : > { %3935 = vst [vmem:[#allocation58_spill] sm:$0xff] %v3126_v15  ;;  %3936 = vst [vmem:[#allocation59_spill] sm:$0xff] %v3129_v30  ;;  %v3148_v14 = vmul.f32 %v2830_v3, %v2811_v58  ;;  %v3152_v32 = vmul.f32 %v2809_v57, %v2868_v16  ;;  %v3156_v45 = vmul.f32 %v2815_v60, %v2868_v16  ;;  %2303 = vtanh.f32 %v928_v9 }
  0xc4   : > { %3937 = vst [vmem:[#allocation60_spill] sm:$0xff] %v3144_v12  ;;  %v467_v18 = vmul.f32 %v2807_v56, %v2924_v26  ;;  %v821_v7 = vadd.f32 %v2954_v38, %v639_v37  ;;  %v469_v27 = vmul.f32 %v2813_v59, %v2924_v26  ;;  %v925_v58 = vadd.f32 %v3064_v4, %v827_v44  ;;  %v1042_v38 = vld [vmem:[%s3849_s6 + $0x30] sm:$0x3] }
  0xc5   : > { %3938 = vst [vmem:[#allocation61_spill] sm:$0xff] %v3148_v14  ;;  %v829_v31 = vadd.f32 %v2996_v33, %v647_v39  ;;  %1065 = vperm.xlu1 %2296, %v1040_v35   ;;  %v3167_v17 = vmul.f32 %v2786_v46, %v2894_v29  ;;  %v598_v16 = vmul.f32 %v2788_v47, %v2894_v29  ;;  %2305 = vtanh.f32 %v917_v8 }
  0xc6   : > { %v919_v22 = vadd.f32 %v3054_v42, %v821_v7  ;;  %v3177_v9 = vmul.f32 %v2790_v48, %v2894_v29  ;;  %v600_v33 = vmul.f32 %v2792_v49, %v2894_v29  ;;  %2307 = vtanh.f32 %v925_v58  ;;  %v3245_v42 = vpop.permute.xlu0 %411 }
  0xc7   : > { %v3181_v13 = vpop.permute.xlu1 %533  ;;  %v927_v11 = vadd.f32 %v3064_v4, %v829_v31  ;;  %v3186_v25 = vmul.f32 %v2775_v41, %v2894_v29  ;;  %v3190_v63 = vmul.f32 %v2779_v43, %v2894_v29  ;;  %v3194_v37 = vmul.f32 %v2809_v57, %v2924_v26  ;;  %v2298_v8 = vpop.eup %2297 }
  0xc8   : > { %v3198_v39 = vmul.f32 %v2815_v60, %v2924_v26  ;;  %v3201_v35 = vadd.f32 %v2884_v21, %v467_v18  ;;  %v3204_v44 = vadd.f32 %v2898_v24, %v469_v27  ;;  %v605_v7 = vmul.f32 %v2786_v46, %v2932_v6  ;;  %v3943_v27 = vld [vmem:[#allocation39_spill] sm:$0xff] }
  0xc9   : > { %3939 = vst [vmem:[#allocation62_spill] sm:$0xff] %v3186_v25  ;;  %3940 = vst [vmem:[#allocation63_spill] sm:$0xff] %v3190_v63  ;;  %v606_v29 = vmul.f32 %v2788_v47, %v2932_v6  ;;  %1075 = vperm.xlu1 %2296, %v1042_v38   ;;  %v607_v58 = vmul.f32 %v2790_v48, %v2932_v6  ;;  %v608_v26 = vmul.f32 %v2792_v49, %v2932_v6 }
  0xca   : > { %v3216_v21 = vmul.f32 %v2775_v41, %v2932_v6  ;;  %2309 = vtanh.f32 %v919_v22  ;;  %v2300_v24 = vpop.eup %2299  ;;  %v3220_v18 = vmul.f32 %v2779_v43, %v2932_v6  ;;  %v479_v31 = vmul.f32 %v2799_v52, %v3943_v27 }
  0xcb   : > { %v480_v38 = vmul.f32 %v2801_v53, %v3943_v27  ;;  %2311 = vtanh.f32 %v927_v11  ;;  %v481_v30 = vmul.f32 %v2803_v54, %v3943_v27  ;;  %v482_v15 = vmul.f32 %v2805_v55, %v3943_v27  ;;  %v3946_v11 = vld [vmem:[#allocation40_spill] sm:$0xff] }
  0xcc   : > { %3941 = vst [vmem:[#allocation64_spill] sm:$0xff] %v3216_v21  ;;  %3942 = vst [vmem:[#allocation65_spill] sm:$0xff] %v3220_v18  ;;  %v2141_v14 = vpack.c.bf16 %v2300_v24, %v2298_v8  ;;  %v3230_v22 = vpop.permute.xlu1 %711  ;;  %v654_v12 = vadd.f32 %v598_v16, %v3085_v28  ;;  %v2302_v6 = vpop.eup %2301  ;;  %v3235_v43 = vmul.f32 %v2809_v57, %v3943_v27  ;;  %v3950_v18 = vld [vmem:[#allocation41_spill] sm:$0xff] }
  0xcd   : > { %v3239_v41 = vmul.f32 %v2815_v60, %v3943_v27  ;;  %v3243_v4 = vmul.f32 %v2794_v50, %v3946_v11  ;;  %v656_v8 = vadd.f32 %v600_v33, %v3095_v19  ;;  %v3250_v28 = vmul.f32 %v2796_v51, %v3946_v11  ;;  %v2304_v50 = vpop.eup %2303 }
  0xce   : > { %3944 = vst [vmem:[#allocation39_spill] sm:$0xff] %v3235_v43  ;;  %v3254_v16 = vmul.f32 %v2799_v52, %v3245_v42  ;;  %v3258_v24 = vmul.f32 %v2801_v53, %v3245_v42  ;;  %v3262_v27 = vmul.f32 %v2803_v54, %v3245_v42  ;;  %2142 = vmatprep.subr.bf16.mxu0 %v2141_v14 }
  0xcf   : > { %3945 = vst [vmem:[#allocation66_spill] sm:$0xff] %v3239_v41  ;;  %3947 = vst [vmem:[#allocation40_spill] sm:$0xff] %v3243_v4  ;;  %v3266_v19 = vmul.f32 %v2805_v55, %v3245_v42  ;;  %v3270_v33 = vmul.f32 %v2807_v56, %v3245_v42  ;;  %v662_v51 = vadd.f32 %v606_v29, %v480_v38  ;;  %v2306_v4 = vpop.eup %2305 }
  0xd0   : > { %3948 = vst [vmem:[#allocation67_spill] sm:$0xff] %v3250_v28  ;;  %v788_v28 = vmul.f32 %v2817_v61, %v3946_v11  ;;  %v2153_v3 = vpack.c.bf16 %v2304_v50, %v2302_v6  ;;  %v836_v41 = vadd.f32 %v3950_v18, %v654_v12  ;;  %v664_v63 = vadd.f32 %v608_v26, %v482_v15  ;;  %v2308_v2 = vpop.eup %2307 }
  0xd1   : > { %3949 = vst [vmem:[#allocation68_spill] sm:$0xff] %v3270_v33  ;;  %v790_v14 = vmul.f32 %v2819_v62, %v3946_v11  ;;  %v3279_v21 = vmul.f32 %v2799_v52, %v3105_v5  ;;  %v488_v33 = vmul.f32 %v2801_v53, %v3105_v5  ;;  %v622_v29 = vmul.f32 %v2788_v47, %v3181_v13  ;;  %v3285_v38 = vpop.permute.xlu1 %894 }
  0xd2   : > { %v838_v50 = vadd.f32 %v3016_v40, %v656_v8  ;;  %v496_v15 = vmul.f32 %v2801_v53, %v3131_v23  ;;  %2154 = vmatprep.subr.bf16.mxu1 %v2153_v3  ;;  %v2143_v12 = vpack.c.bf16 %v2308_v2, %v2306_v4  ;;  %v934_v26 = vadd.f32 %v3285_v38, %v836_v41 }
  0xd3   : > { %v653_v18 = vadd.f32 %v3167_v17, %v3075_v34  ;;  %v661_v56 = vadd.f32 %v605_v7, %v479_v31  ;;  %v787_v43 = vmul.f32 %v2824_v0, %v3946_v11  ;;  %v655_v25 = vadd.f32 %v3177_v9, %v3089_v10 }
  0xd4   : > { %v936_v6 = vadd.f32 %v3285_v38, %v838_v50  ;;  %v2310_v40 = vpop.eup %2309  ;;  %v490_v53 = vmul.f32 %v2805_v55, %v3105_v5  ;;  %v624_v2 = vmul.f32 %v2792_v49, %v3181_v13  ;;  %2144 = vmatpush1.bf16.msra.mxu0 %v2143_v12  ;;  %v844_v41 = vadd.f32 %v788_v28, %v662_v51  ;;  %v3951_v51 = vld [vmem:[#allocation44_spill] sm:$0xff] }
  0xd5   : > { %v846_v3 = vadd.f32 %v790_v14, %v664_v63  ;;  %v2312_v34 = vpop.eup %2311  ;;  %v498_v4 = vmul.f32 %v2805_v55, %v3131_v23  ;;  %v3304_v17 = vpop.permute.xlu1 %899  ;;  %v663_v7 = vadd.f32 %v607_v58, %v481_v30  ;;  %v789_v10 = vmul.f32 %v2826_v1, %v3946_v11  ;;  %v3952_v14 = vld [vmem:[#allocation45_spill] sm:$0xff] }
  0xd6   : > { %v678_v9 = vadd.f32 %v622_v29, %v496_v15  ;;  %v2155_v31 = vpack.c.bf16 %v2312_v34, %v2310_v40  ;;  %v942_v8 = vadd.f32 %v3304_v17, %v844_v41  ;;  %2313 = vtanh.f32 %v934_v26  ;;  %v3953_v58 = vld [vmem:[#allocation17_spill] sm:$0xff]  ;;  %v3954_v26 = vld [vmem:[#allocation52_spill] sm:$0xff] }
  0xd7   : > { %v944_v50 = vadd.f32 %v3304_v17, %v846_v3  ;;  %2315 = vtanh.f32 %v936_v6  ;;  %v835_v63 = vadd.f32 %v3951_v51, %v653_v18  ;;  %v843_v28 = vadd.f32 %v787_v43, %v661_v56  ;;  %v3955_v6 = vld [vmem:[#allocation18_spill] sm:$0xff] }
  0xd8   : > { %v837_v12 = vadd.f32 %v3952_v14, %v655_v25  ;;  %2156 = vmatpush1.bf16.msra.mxu1 %v2155_v31  ;;  %2317 = vtanh.f32 %v942_v8  ;;  %v796_v55 = vmul.f32 %v2817_v61, %v3230_v22  ;;  %v680_v30 = vadd.f32 %v624_v2, %v498_v4  ;;  %v3956_v2 = vld [vmem:[#allocation34_spill] sm:$0xff]  ;;  %v3957_v4 = vld [vmem:[#allocation25_spill] sm:$0xff]  ;;  %v3337_v31 = vpop.permute.xlu0 %909 }
  0xd9   : > { %v642_v29 = vadd.f32 %v3953_v58, %v3152_v32  ;;  %2319 = vtanh.f32 %v944_v50  ;;  %v933_v15 = vadd.f32 %v3285_v38, %v835_v63  ;;  %v860_v40 = vadd.f32 %v3954_v26, %v678_v9  ;;  %v3959_v50 = vld [vmem:[#allocation22_spill] sm:$0xff]  ;;  %v3960_v63 = vld [vmem:[#allocation55_spill] sm:$0xff] }
  0xda   : > { %v644_v18 = vadd.f32 %v3955_v6, %v3156_v45  ;;  %v3320_v43 = vpop.permute.xlu1 %537  ;;  %v941_v56 = vadd.f32 %v3304_v17, %v843_v28  ;;  %v845_v25 = vadd.f32 %v789_v10, %v663_v7  ;;  %v798_v41 = vmul.f32 %v2819_v62, %v3230_v22  ;;  %v3958_v10 = vld [vmem:[#allocation20_spill] sm:$0xff] }
  0xdb   : > { %v3326_v3 = vadd.f32 %v3956_v2, %v642_v29  ;;  %v3330_v32 = vmul.f32 %v2803_v54, %v3105_v5  ;;  %v495_v34 = vmul.f32 %v2799_v52, %v3131_v23  ;;  %v935_v45 = vadd.f32 %v3285_v38, %v837_v12  ;;  %v3961_v12 = vld [vmem:[#allocation26_spill] sm:$0xff] }
  0xdc   : > { %v650_v9 = vadd.f32 %v3957_v4, %v3194_v37  ;;  %v943_v7 = vadd.f32 %v3304_v17, %v845_v25  ;;  %v670_v8 = vadd.f32 %v3958_v10, %v488_v33  ;;  %v672_v51 = vadd.f32 %v3959_v50, %v490_v53  ;;  %v3966_v10 = vld [vmem:[#allocation27_spill] sm:$0xff]  ;;  %v3967_v50 = vld [vmem:[#allocation33_spill] sm:$0xff] }
  0xdd   : > { %v862_v28 = vadd.f32 %v3960_v63, %v680_v30  ;;  %v621_v14 = vmul.f32 %v2786_v46, %v3181_v13  ;;  %2321 = vtanh.f32 %v933_v15  ;;  %v958_v52 = vadd.f32 %v3337_v31, %v860_v40  ;;  %v3962_v30 = vld [vmem:[#allocation46_spill] sm:$0xff]  ;;  %v3963_v15 = vld [vmem:[#allocation35_spill] sm:$0xff] }
  0xde   : > { %v652_v58 = vadd.f32 %v3961_v12, %v3198_v39  ;;  %v497_v37 = vmul.f32 %v2803_v54, %v3131_v23  ;;  %2323 = vtanh.f32 %v941_v56  ;;  %v852_v29 = vadd.f32 %v796_v55, %v670_v8 }
  0xdf   : > { %v854_v26 = vadd.f32 %v798_v41, %v672_v51  ;;  %v623_v33 = vmul.f32 %v2790_v48, %v3181_v13  ;;  %v3352_v53 = vpop.permute.xlu1 %904  ;;  %2325 = vtanh.f32 %v935_v45  ;;  %v3355_v6 = vadd.f32 %v3962_v30, %v650_v9  ;;  %v3964_v45 = vld [vmem:[#allocation47_spill] sm:$0xff] }
  0xe0   : > { %v3358_v40 = vadd.f32 %v3963_v15, %v644_v18  ;;  %v2314_v25 = vpop.eup %2313  ;;  %2327 = vtanh.f32 %v943_v7  ;;  %v950_v39 = vadd.f32 %v3352_v53, %v852_v29  ;;  %v960_v55 = vadd.f32 %v3337_v31, %v862_v28  ;;  %v3965_v7 = vld [vmem:[#allocation29_spill] sm:$0xff]  ;;  %v3968_v28 = vld [vmem:[#allocation30_spill] sm:$0xff] }
  0xe1   : > { %v952_v54 = vadd.f32 %v3352_v53, %v854_v26  ;;  %v2316_v56 = vpop.eup %2315  ;;  %v629_v41 = vmul.f32 %v2786_v46, %v3320_v43  ;;  %2329 = vtanh.f32 %v958_v52  ;;  %v677_v2 = vadd.f32 %v621_v14, %v495_v34  ;;  %v3969_v14 = vld [vmem:[#allocation28_spill] sm:$0xff] }
  0xe2   : > { %v3366_v4 = vadd.f32 %v3964_v45, %v652_v58  ;;  %v2318_v9 = vpop.eup %2317  ;;  %v630_v18 = vmul.f32 %v2788_v47, %v3320_v43  ;;  %2331 = vtanh.f32 %v950_v39  ;;  %v3372_v8 = vadd.f32 %v3966_v10, %v3965_v7 }
  0xe3   : > { %v3376_v51 = vadd.f32 %v3967_v50, %v3201_v35  ;;  %v2320_v63 = vpop.eup %2319  ;;  %v631_v46 = vmul.f32 %v2790_v48, %v3320_v43  ;;  %v2145_v34 = vpack.c.bf16 %v2318_v9, %v2314_v25  ;;  %2333 = vtanh.f32 %v952_v54 }
  0xe4   : > { %v3382_v52 = vadd.f32 %v3969_v14, %v3968_v28  ;;  %v632_v47 = vmul.f32 %v2792_v49, %v3320_v43  ;;  %v3386_v12 = vpop.permute.xlu1 %719  ;;  %v2157_v58 = vpack.c.bf16 %v2320_v63, %v2316_v56  ;;  %2335 = vtanh.f32 %v960_v55  ;;  %v3972_v14 = vld [vmem:[#allocation36_spill] sm:$0xff] }
  0xe5   : > { %v795_v35 = vmul.f32 %v2824_v0, %v3230_v22  ;;  %v685_v29 = vadd.f32 %v629_v41, %v3254_v16  ;;  %v811_v48 = vmul.f32 %v2824_v0, %v3386_v12  ;;  %v812_v26 = vmul.f32 %v2817_v61, %v3386_v12  ;;  %2146 = vmatprep.subr.bf16.mxu0 %v2145_v34 }
  0xe6   : > { %v813_v30 = vmul.f32 %v2826_v1, %v3386_v12  ;;  %v686_v49 = vadd.f32 %v630_v18, %v3258_v24  ;;  %v814_v15 = vmul.f32 %v2819_v62, %v3386_v12  ;;  %2158 = vmatprep.subr.bf16.mxu1 %v2157_v58  ;;  %v679_v25 = vadd.f32 %v623_v33, %v497_v37  ;;  %v3970_v37 = vld [vmem:[#allocation19_spill] sm:$0xff] }
  0xe7   : > { %v797_v16 = vmul.f32 %v2826_v1, %v3230_v22  ;;  %v2322_v39 = vpop.eup %2321  ;;  %v3404_v0 = vmul.f32 %v2809_v57, %v3245_v42  ;;  %v3408_v61 = vmul.f32 %v2813_v59, %v3245_v42  ;;  %v687_v54 = vadd.f32 %v631_v46, %v3262_v27  ;;  %v3971_v1 = vld [vmem:[#allocation21_spill] sm:$0xff] }
  0xe8   : > { %v867_v24 = vadd.f32 %v811_v48, %v685_v29  ;;  %v2324_v55 = vpop.eup %2323  ;;  %v688_v62 = vadd.f32 %v632_v47, %v3266_v19  ;;  %v868_v56 = vadd.f32 %v812_v26, %v686_v49  ;;  %v669_v33 = vadd.f32 %v3970_v37, %v3279_v21  ;;  %v3423_v19 = vpop.permute.xlu0 %914  ;;  %v3973_v29 = vld [vmem:[#allocation56_spill] sm:$0xff]  ;;  %v3974_v48 = vld [vmem:[#allocation62_spill] sm:$0xff]  ;;  %v3975_v26 = vld [vmem:[#allocation39_spill] sm:$0xff] }
  0xe9   : > { %v671_v41 = vadd.f32 %v3971_v1, %v3330_v32  ;;  %v2326_v45 = vpop.eup %2325  ;;  %v3418_v9 = vmul.f32 %v2815_v60, %v3245_v42  ;;  %v494_v18 = vmul.f32 %v2815_v60, %v3105_v5  ;;  %v869_v27 = vadd.f32 %v813_v30, %v687_v54  ;;  %v3976_v30 = vld [vmem:[#allocation64_spill] sm:$0xff]  ;;  %v3982_v1 = vld [vmem:[#allocation65_spill] sm:$0xff] }
  0xea   : > { %v859_v7 = vadd.f32 %v3123_v36, %v677_v2  ;;  %v2328_v10 = vpop.eup %2327  ;;  %v870_v50 = vadd.f32 %v814_v15, %v688_v62  ;;  %v851_v63 = vadd.f32 %v795_v35, %v669_v33  ;;  %v861_v46 = vadd.f32 %v3136_v20, %v679_v25  ;;  %v3979_v62 = vld [vmem:[#allocation57_spill] sm:$0xff]  ;;  %v3981_v33 = vld [vmem:[#allocation66_spill] sm:$0xff] }
  0xeb   : > { %v853_v21 = vadd.f32 %v797_v16, %v671_v41  ;;  %v2330_v32 = vpop.eup %2329  ;;  %v965_v34 = vadd.f32 %v3423_v19, %v867_v24  ;;  %v2147_v28 = vpack.c.bf16 %v2324_v55, %v2322_v39  ;;  %v2159_v42 = vpack.c.bf16 %v2328_v10, %v2326_v45  ;;  %v3978_v24 = vld [vmem:[#allocation48_spill] sm:$0xff] }
  0xec   : > { %v3429_v47 = vadd.f32 %v3972_v14, %v3204_v44  ;;  %v2332_v58 = vpop.eup %2331  ;;  %v966_v36 = vadd.f32 %v3423_v19, %v868_v56  ;;  %v949_v2 = vadd.f32 %v3352_v53, %v851_v63  ;;  %v658_v35 = vadd.f32 %v3974_v48, %v3973_v29  ;;  %v3977_v44 = vld [vmem:[#allocation15_spill] sm:$0xff]  ;;  %v3983_v10 = vld [vmem:[#allocation16_spill] sm:$0xff]  ;;  %v3986_v14 = vld [vmem:[#allocation37_spill] sm:$0xff] }
  0xed   : > { %v666_v20 = vadd.f32 %v3976_v30, %v3975_v26  ;;  %v2334_v49 = vpop.eup %2333  ;;  %v967_v15 = vadd.f32 %v3423_v19, %v869_v27  ;;  %2148 = vmatpush1.bf16.msra.mxu0 %v2147_v28  ;;  %2160 = vmatpush1.bf16.msra.mxu1 %v2159_v42  ;;  %v2149_v25 = vpack.c.bf16 %v2330_v32, %v2332_v58  ;;  %v3980_v56 = vld [vmem:[#allocation63_spill] sm:$0xff]  ;;  %2337 = vtanh.f32 %v965_v34  ;;  %v3984_v28 = vld [vmem:[#allocation53_spill] sm:$0xff]  ;;  %v3987_v48 = vld [vmem:[#allocation42_spill] sm:$0xff] }
  0xee   : > { %v792_v16 = vmul.f32 %v3977_v44, %v3946_v11  ;;  %v2336_v39 = vpop.eup %2335  ;;  %v968_v54 = vadd.f32 %v3423_v19, %v870_v50  ;;  %v840_v55 = vadd.f32 %v3978_v24, %v658_v35  ;;  %v660_v37 = vadd.f32 %v3980_v56, %v3979_v62  ;;  %v3985_v42 = vld [vmem:[#allocation31_spill] sm:$0xff]  ;;  %v3988_v35 = vld [vmem:[#allocation40_spill] sm:$0xff]  ;;  %v3990_v30 = vld [vmem:[#allocation38_spill] sm:$0xff] }
  0xef   : > { %v668_v41 = vadd.f32 %v3982_v1, %v3981_v33  ;;  %2150 = vmatprep.subr.bf16.mxu0 %v2149_v25  ;;  %v2161_v45 = vpack.c.bf16 %v2336_v39, %v2334_v49  ;;  %v794_v63 = vmul.f32 %v3983_v10, %v3946_v11  ;;  %2339 = vtanh.f32 %v966_v36  ;;  %v3989_v36 = vld [vmem:[#allocation32_spill] sm:$0xff]  ;;  %v3991_v49 = vld [vmem:[#allocation10_spill] sm:$0xff]  ;;  %v3994_v39 = vld [vmem:[#allocation67_spill] sm:$0xff] }
  0xf0   : > { %v848_v27 = vadd.f32 %v792_v16, %v666_v20  ;;  %v957_v32 = vadd.f32 %v3337_v31, %v859_v7  ;;  %v842_v50 = vadd.f32 %v3984_v28, %v660_v37  ;;  %v3452_v58 = vadd.f32 %v3986_v14, %v3985_v42  ;;  %v3993_v16 = vld [vmem:[#allocation43_spill] sm:$0xff]  ;;  %v3997_v56 = vld [vmem:[#allocation54_spill] sm:$0xff]  ;;  %v3998_v33 = vld [vmem:[#allocation24_spill] sm:$0xff] }
  0xf1   : > { %2341 = vtanh.f32 %v967_v15  ;;  %2162 = vmatprep.subr.bf16.mxu1 %v2161_v45  ;;  %v951_v29 = vadd.f32 %v3352_v53, %v853_v21  ;;  %v850_v34 = vadd.f32 %v794_v63, %v668_v41  ;;  %v3457_v26 = vadd.f32 %v3988_v35, %v3987_v48  ;;  %v3992_v21 = vld [vmem:[#allocation51_spill] sm:$0xff]  ;;  %v3999_v63 = vld [vmem:[#allocation9_spill] sm:$0xff] }
  0xf2   : > { %v3461_v11 = vmul.f32 %v2809_v57, %v3105_v5  ;;  %2343 = vtanh.f32 %v968_v54  ;;  %v959_v7 = vadd.f32 %v3337_v31, %v861_v46  ;;  %v3466_v20 = vadd.f32 %v3990_v30, %v3989_v36  ;;  %v3995_v5 = vld [vmem:[#allocation14_spill] sm:$0xff]  ;;  %v3996_v46 = vld [vmem:[#allocation8_spill] sm:$0xff] }
  0xf3   : > { %v627_v15 = vmul.f32 %v3991_v49, %v3181_v13  ;;  %2345 = vtanh.f32 %v949_v2  ;;  %v922_v25 = vadd.f32 %v3992_v21, %v3326_v3  ;;  %v3474_v24 = vadd.f32 %v3994_v39, %v3993_v16  ;;  %v4003_v30 = vld [vmem:[#allocation50_spill] sm:$0xff] }
  0xf4   : > { %v499_v54 = vmul.f32 %v3995_v5, %v3131_v23  ;;  %v625_v62 = vmul.f32 %v3996_v46, %v3181_v13  ;;  %2347 = vtanh.f32 %v957_v32  ;;  %v930_v37 = vadd.f32 %v3997_v56, %v3355_v6 }
  0xf5   : > { %v501_v2 = vmul.f32 %v2813_v59, %v3131_v23  ;;  %2349 = vtanh.f32 %v951_v29  ;;  %v924_v3 = vadd.f32 %v3992_v21, %v3358_v40  ;;  %v3487_v1 = vadd.f32 %v3998_v33, %v494_v18  ;;  %v4000_v18 = vld [vmem:[#allocation11_spill] sm:$0xff]  ;;  %v4002_v29 = vld [vmem:[#allocation13_spill] sm:$0xff]  ;;  %v4005_v33 = vld [vmem:[#allocation60_spill] sm:$0xff] }
  0xf6   : > { %v500_v41 = vmul.f32 %v2809_v57, %v3131_v23  ;;  %v502_v45 = vmul.f32 %v2815_v60, %v3131_v23  ;;  %2351 = vtanh.f32 %v959_v7  ;;  %v932_v6 = vadd.f32 %v3997_v56, %v3366_v4  ;;  %v4001_v4 = vld [vmem:[#allocation12_spill] sm:$0xff] }
  0xf7   : > { %v626_v59 = vmul.f32 %v3999_v63, %v3181_v13  ;;  %v683_v32 = vadd.f32 %v627_v15, %v501_v2  ;;  %2353 = vtanh.f32 %v922_v25  ;;  %v921_v40 = vadd.f32 %v3992_v21, %v3372_v8  ;;  %v3505_v23 = vpop.eup %2337 }
  0xf8   : > { %v628_v28 = vmul.f32 %v4000_v18, %v3181_v13  ;;  %v3501_v57 = vadd.f32 %v625_v62, %v499_v54  ;;  %2355 = vtanh.f32 %v930_v37  ;;  %v929_v60 = vadd.f32 %v3997_v56, %v3376_v51  ;;  %v4004_v37 = vld [vmem:[#allocation23_spill] sm:$0xff] }
  0xf9   : > { %v3509_v42 = vmul.f32 %v4001_v4, %v3230_v22  ;;  %v634_v14 = vmul.f32 %v3999_v63, %v3320_v43  ;;  %2357 = vtanh.f32 %v924_v3  ;;  %v923_v8 = vadd.f32 %v3992_v21, %v3382_v52  ;;  %v2340_v13 = vpop.eup %2339 }
  0xfa   : > { %v3517_v48 = vmul.f32 %v4002_v29, %v3230_v22  ;;  %v3521_v51 = vmul.f32 %v3996_v46, %v3320_v43  ;;  %2359 = vtanh.f32 %v932_v6  ;;  %v931_v35 = vadd.f32 %v3997_v56, %v3429_v47 }
  0xfb   : > { %v3525_v7 = vpop.eup %2341  ;;  %v3529_v36 = vmul.f32 %v3991_v49, %v3320_v43  ;;  %2361 = vtanh.f32 %v921_v40  ;;  %v938_v52 = vadd.f32 %v3285_v38, %v840_v55  ;;  %v3533_v15 = vadd.f32 %v4003_v30, %v683_v32  ;;  %v3564_v40 = vld [vmem:[%s3848_s5] sm:$0xff] }
  0xfc   : > { %v2344_v21 = vpop.eup %2343  ;;  %v636_v25 = vmul.f32 %v4000_v18, %v3320_v43  ;;  %2363 = vtanh.f32 %v929_v60  ;;  %v946_v47 = vadd.f32 %v3304_v17, %v848_v27  ;;  %v682_v16 = vadd.f32 %v626_v59, %v500_v41 }
  0xfd   : > { %v2346_v39 = vpop.eup %2345  ;;  %v690_v5 = vadd.f32 %v634_v14, %v3404_v0  ;;  %2365 = vtanh.f32 %v923_v8  ;;  %v940_v49 = vadd.f32 %v3285_v38, %v842_v50  ;;  %v800_v55 = vmul.f32 %v3977_v44, %v3230_v22 }
  0xfe   : > { %v2348_v54 = vpop.eup %2347  ;;  %2367 = vtanh.f32 %v931_v35  ;;  %v948_v46 = vadd.f32 %v3304_v17, %v850_v34  ;;  %v937_v43 = vadd.f32 %v3285_v38, %v3452_v58  ;;  %v684_v62 = vadd.f32 %v628_v28, %v502_v45 }
  0xff   : > { %v2350_v56 = vpop.eup %2349  ;;  %v2151_v27 = vpack.c.bf16 %v2348_v54, %v2346_v39  ;;  %2369 = vtanh.f32 %v938_v52  ;;  %v674_v0 = vadd.f32 %v4004_v37, %v3461_v11  ;;  %v802_v50 = vmul.f32 %v3983_v10, %v3230_v22 }
 0x100   : > { %v2352_v2 = vpop.eup %2351  ;;  %v692_v3 = vadd.f32 %v636_v25, %v3418_v9  ;;  %2371 = vtanh.f32 %v946_v47  ;;  %v945_v34 = vadd.f32 %v3304_v17, %v3457_v26  ;;  %v864_v41 = vadd.f32 %v4005_v33, %v682_v16  ;;  %v4006_v26 = vld [vmem:[#allocation61_spill] sm:$0xff]  ;;  %v4010_v47 = vld [vmem:[#allocation59_spill] sm:$0xff] }
 0x101   : > { %v2354_v58 = vpop.eup %2353  ;;  %2152 = vmatpush1.bf16.msra.mxu0 %v2151_v27  ;;  %v2163_v45 = vpack.c.bf16 %v2352_v2, %v2350_v56  ;;  %2373 = vtanh.f32 %v940_v49  ;;  %v939_v6 = vadd.f32 %v3285_v38, %v3466_v20  ;;  %v856_v11 = vadd.f32 %v800_v55, %v674_v0  ;;  %v3628_v33 = vld [vmem:[%s3848_s5 + $0x18] sm:$0xff] }
 0x102   : > { %v2356_v63 = vpop.eup %2355  ;;  %v816_v22 = vmul.f32 %v3977_v44, %v3386_v12  ;;  %2087 = vmatprep.subr.msk.mxu0 %vm1100_vm0, %v2340_v13  ;;  %2375 = vtanh.f32 %v948_v46  ;;  %v947_v9 = vadd.f32 %v3304_v17, %v3474_v24  ;;  %v866_v59 = vadd.f32 %v4006_v26, %v684_v62  ;;  %v4007_v24 = vld [vmem:[#allocation49_spill] sm:$0xff]  ;;  %v4008_v13 = vld [vmem:[#allocation58_spill] sm:$0xff] }
 0x103   : > { %v2358_v32 = vpop.eup %2357  ;;  %2164 = vmatpush1.bf16.msra.mxu1 %v2163_v45  ;;  %v2165_v38 = vpack.c.bf16 %v2356_v63, %v2354_v58  ;;  %2377 = vtanh.f32 %v937_v43  ;;  %v954_v20 = vadd.f32 %v3352_v53, %v856_v11  ;;  %v858_v44 = vadd.f32 %v802_v50, %v3487_v1 }
 0x104   : > { %v2360_v18 = vpop.eup %2359  ;;  %v818_v28 = vmul.f32 %v3983_v10, %v3386_v12  ;;  %2096 = vmatprep.subr.msk.mxu1 %vm1100_vm0, %v2344_v21  ;;  %2379 = vtanh.f32 %v945_v34  ;;  %v962_v17 = vadd.f32 %v3337_v31, %v864_v41  ;;  %v863_v60 = vadd.f32 %v4007_v24, %v3501_v57 }
 0x105   : > { %v2362_v14 = vpop.eup %2361  ;;  %2088 = vmatpush1.msk.msra.mxu0 %vm1100_vm0, %v3505_v23  ;;  %v2177_v8 = vpack.c.bf16 %v2360_v18, %v2358_v32  ;;  %2381 = vtanh.f32 %v939_v6  ;;  %v956_v1 = vadd.f32 %v3352_v53, %v858_v44  ;;  %v855_v35 = vadd.f32 %v3509_v42, %v4008_v13  ;;  %v3590_v42 = vld [vmem:[%s3848_s5 + $0x8] sm:$0xff] }
 0x106   : > { %v2364_v10 = vpop.eup %2363  ;;  %v815_v52 = vmul.f32 %v4001_v4, %v3386_v12  ;;  %v872_v30 = vadd.f32 %v816_v22, %v690_v5  ;;  %2089 = vmatmul.mubr.msk.f32.vlgmr.msra.gmra.mrb[0].mxu0 %vm1078_vm1, %v3564_v40  ;;  %2166 = vmatprep.subr.bf16.mxu0 %v2165_v38  ;;  %2383 = vtanh.f32 %v947_v9  ;;  %v964_v57 = vadd.f32 %v3337_v31, %v866_v59  ;;  %v4011_v5 = vld [vmem:[#allocation68_spill] sm:$0xff] }
 0x107   : > { %v2366_v23 = vpop.eup %2365  ;;  %2097 = vmatpush1.msk.msra.mxu1 %vm1100_vm0, %v3525_v7  ;;  %v2167_v21 = vpack.c.bf16 %v2364_v10, %v2362_v14  ;;  %v4009_v25 = vmov 0.0   ;;  %2385 = vtanh.f32 %v954_v20  ;;  %v953_v4 = vadd.f32 %v3352_v53, %v855_v35  ;;  %v1034_v44 = vld [vmem:[%s3848_s5 + $0x28] sm:$0xff] }
 0x108   : > { %1195 = vmatprep.mubr.f32.mxu0 %v4009_v25  ;;  %v857_v16 = vadd.f32 %v3517_v48, %v4010_v47  ;;  %v2368_v39 = vpop.eup %2367  ;;  %v689_v49 = vadd.f32 %v3521_v51, %v4011_v5  ;;  %v817_v7 = vmul.f32 %v4002_v29, %v3386_v12  ;;  %2098 = vmatmul.mubr.msk.f32.vlgmr.msra.gmra.mrb[0].mxu1 %vm1078_vm1, %v3564_v40  ;;  %2387 = vtanh.f32 %v962_v17 }
 0x109   : > { %2178 = vmatprep.subr.bf16.mxu1 %v2177_v8  ;;  %v961_v55 = vadd.f32 %v3337_v31, %v863_v60  ;;  %v2370_v54 = vpop.eup %2369  ;;  %v874_v46 = vadd.f32 %v818_v28, %v692_v3  ;;  %2168 = vmatpush1.bf16.msra.mxu0 %v2167_v21  ;;  %v2179_v43 = vpack.c.bf16 %v2368_v39, %v2366_v23  ;;  %2389 = vtanh.f32 %v956_v1  ;;  %v1035_v60 = vld [vmem:[%s3848_s5 + $0x30] sm:$0x3]  ;;  %v3706_v23 = vpop.permute.xlu0 %1050 }
 0x10a   : > { %1302 = vmatprep.mubr.f32.mxu1 %v4009_v25  ;;  %v955_v48 = vadd.f32 %v3352_v53, %v857_v16  ;;  %v2372_v51 = vpop.eup %2371  ;;  %v691_v12 = vadd.f32 %v3529_v36, %v3408_v61  ;;  %v871_v29 = vadd.f32 %v815_v52, %v689_v49  ;;  %2090 = vmatmul.mubr.msk.f32.gmra.mrb[2].mxu0 %vm1078_vm1, %v3590_v42  ;;  %2391 = vtanh.f32 %v964_v57  ;;  %v3615_v53 = vld [vmem:[%s3848_s5 + $0x10] sm:$0xff] }
 0x10b   : > { %v963_v62 = vadd.f32 %v3337_v31, %v3533_v15  ;;  %v2374_v56 = vpop.eup %2373  ;;  %v970_v27 = vadd.f32 %v3423_v19, %v872_v30  ;;  %2180 = vmatpush1.bf16.msra.mxu1 %v2179_v43  ;;  %v2169_v37 = vpack.c.bf16 %v2372_v51, %v2370_v54  ;;  %1201 = vmatprep.mubr.f32.mxu0 %v4009_v25  ;;  %2393 = vtanh.f32 %v953_v4 }
 0x10c   : > { %v2376_v61 = vpop.eup %2375  ;;  %v873_v36 = vadd.f32 %v817_v7, %v691_v12  ;;  %2099 = vmatmul.mubr.msk.f32.gmra.mrb[2].mxu1 %vm1078_vm1, %v3590_v42  ;;  %2395 = vtanh.f32 %v961_v55  ;;  %v972_v15 = vadd.f32 %v3423_v19, %v874_v46  ;;  %v969_v2 = vadd.f32 %v3423_v19, %v871_v29 }
 0x10d   : > { %v2378_v31 = vpop.eup %2377  ;;  %2170 = vmatprep.subr.bf16.mxu0 %v2169_v37  ;;  %v2181_v0 = vpack.c.bf16 %v2376_v61, %v2374_v56  ;;  %1308 = vmatprep.mubr.f32.mxu1 %v4009_v25  ;;  %2397 = vtanh.f32 %v955_v48 }
 0x10e   : > { %v2380_v50 = vpop.eup %2379  ;;  %2091 = vmatmul.mubr.msk.f32.gmra.mrb[4].mxu0 %vm1078_vm1, %v3615_v53  ;;  %2399 = vtanh.f32 %v963_v62  ;;  %v971_v58 = vadd.f32 %v3423_v19, %v873_v36  ;;  %v1033_v19 = vld [vmem:[%s3848_s5 + $0x20] sm:$0xff]  ;;  %v3718_v62 = vpop.permute.xlu0 %1060 }
 0x10f   : > { %v2382_v3 = vpop.eup %2381  ;;  %2401 = vtanh.f32 %v970_v27  ;;  %2182 = vmatprep.subr.bf16.mxu1 %v2181_v0  ;;  %v2171_v34 = vpack.c.bf16 %v2380_v50, %v2378_v31  ;;  %1207 = vmatprep.mubr.f32.mxu0 %v4009_v25 }
 0x110   : > { %v2384_v41 = vpop.eup %2383  ;;  %2100 = vmatmul.mubr.msk.f32.gmra.mrb[4].mxu1 %vm1078_vm1, %v3615_v53  ;;  %2403 = vtanh.f32 %v972_v15 }
 0x111   : > { %v2386_v45 = vpop.eup %2385  ;;  %2172 = vmatpush1.bf16.msra.mxu0 %v2171_v34  ;;  %v2183_v6 = vpack.c.bf16 %v2384_v41, %v2382_v3  ;;  %1314 = vmatprep.mubr.f32.mxu1 %v4009_v25  ;;  %2405 = vtanh.f32 %v969_v2 }
 0x112   : > { %v2388_v11 = vpop.eup %2387  ;;  %2092 = vmatmul.mubr.msk.f32.gmra.mrb[6].mxu0 %vm1078_vm1, %v3628_v33  ;;  %2407 = vtanh.f32 %v971_v58 }
 0x113   : > { %v2390_v63 = vpop.eup %2389  ;;  %2184 = vmatpush1.bf16.msra.mxu1 %v2183_v6  ;;  %v2173_v22 = vpack.c.bf16 %v2388_v11, %v2386_v45  ;;  %1213 = vmatprep.mubr.f32.mxu0 %v4009_v25 }
 0x114   : > { %v2392_v9 = vpop.eup %2391  ;;  %2101 = vmatmul.mubr.msk.f32.gmra.mrb[6].mxu1 %vm1078_vm1, %v3628_v33 }
 0x115   : > { %v2394_v26 = vpop.eup %2393  ;;  %2174 = vmatprep.subr.bf16.mxu0 %v2173_v22  ;;  %v2185_v59 = vpack.c.bf16 %v2392_v9, %v2390_v63  ;;  %1320 = vmatprep.mubr.f32.mxu1 %v4009_v25 }
 0x116   : > { %v2396_v32 = vpop.eup %2395  ;;  %2093 = vmatmul.mubr.msk.f32.gmra.mrb[8].mxu0 %vm1078_vm1, %v1033_v19 }
 0x117   : > { %v2398_v38 = vpop.eup %2397  ;;  %2186 = vmatprep.subr.bf16.mxu1 %v2185_v59  ;;  %v2175_v20 = vpack.c.bf16 %v2396_v32, %v2394_v26  ;;  %1219 = vmatprep.mubr.f32.mxu0 %v4009_v25 }
 0x118   : > { %v2400_v18 = vpop.eup %2399  ;;  %2102 = vmatmul.mubr.msk.f32.gmra.mrb[8].mxu1 %vm1078_vm1, %v1033_v19 }
 0x119   : > { %v2402_v28 = vpop.eup %2401  ;;  %2176 = vmatpush1.bf16.msra.mxu0 %v2175_v20  ;;  %v2187_v17 = vpack.c.bf16 %v2400_v18, %v2398_v38  ;;  %1326 = vmatprep.mubr.f32.mxu1 %v4009_v25  ;;  %v3730_v20 = vpop.permute.xlu0 %1070 }
 0x11a   : > { %2105 = vmatprep.subr.msk.mxu0 %vm1100_vm0, %v2402_v28  ;;  %2094 = vmatmul.mubr.msk.f32.gmra.mrb[10].mxu0 %vm1078_vm1, %v1034_v44  ;;  %v2404_v24 = vpop.eup %2403 }
 0x11b   : > { %2188 = vmatpush1.bf16.msra.mxu1 %v2187_v17  ;;  %1225 = vmatprep.mubr.f32.mxu0 %v4009_v25  ;;  %v2406_v14 = vpop.eup %2405 }
 0x11c   : > { %2114 = vmatprep.subr.msk.mxu1 %vm1100_vm0, %v2404_v24  ;;  %2103 = vmatmul.mubr.msk.f32.gmra.mrb[10].mxu1 %vm1078_vm1, %v1034_v44  ;;  %v2408_v8 = vpop.eup %2407 }
 0x11d   : > { %2106 = vmatpush1.msk.msra.mxu0 %vm1100_vm0, %v2406_v14  ;;  %1332 = vmatprep.mubr.f32.mxu1 %v4009_v25 }
 0x11e   : > { %2095 = vmatmul.mubr.msk.f32.gmra.mrb[12].mxu0 %vm1078_vm1, %v1035_v60 }
 0x11f   : > { %2115 = vmatpush1.msk.msra.mxu1 %vm1100_vm0, %v2408_v8  ;;  %1403 = vmatprep.mubr.f32.mxu0 %v4009_v25 }
 0x120   : > { %2104 = vmatmul.mubr.msk.f32.gmra.mrb[12].mxu1 %vm1078_vm1, %v1035_v60 }
 0x121   : > { %1510 = vmatprep.mubr.f32.mxu1 %v4009_v25 }
 0x122   : > { %2107 = vmatmul.mubr.msk.f32.vlgmr.msra.gmra.mrb[14].mxu0 %vm1078_vm1, %v3564_v40 }
 0x123   : > { %1409 = vmatprep.mubr.f32.mxu0 %v4009_v25 }
 0x124   : > { %2116 = vmatmul.mubr.msk.f32.vlgmr.msra.gmra.mrb[14].mxu1 %vm1078_vm1, %v3564_v40 }
 0x125   : > { %1516 = vmatprep.mubr.f32.mxu1 %v4009_v25 }
 0x126   : > { %2108 = vmatmul.mubr.msk.f32.gmra.mrb[16].mxu0 %vm1078_vm1, %v3590_v42 }
 0x127   : > { %1415 = vmatprep.mubr.f32.mxu0 %v4009_v25 }
 0x128   : > { %2117 = vmatmul.mubr.msk.f32.gmra.mrb[16].mxu1 %vm1078_vm1, %v3590_v42 }
 0x129   : > { %1522 = vmatprep.mubr.f32.mxu1 %v4009_v25 }
 0x12a   : > { %2109 = vmatmul.mubr.msk.f32.gmra.mrb[18].mxu0 %vm1078_vm1, %v3615_v53 }
 0x12b   : > { %1421 = vmatprep.mubr.f32.mxu0 %v4009_v25 }
 0x12c   : > { %2118 = vmatmul.mubr.msk.f32.gmra.mrb[18].mxu1 %vm1078_vm1, %v3615_v53 }
 0x12d   : > { %1528 = vmatprep.mubr.f32.mxu1 %v4009_v25 }
 0x12e   : > { %2110 = vmatmul.mubr.msk.f32.gmra.mrb[20].mxu0 %vm1078_vm1, %v3628_v33 }
 0x12f   : > { %1427 = vmatprep.mubr.f32.mxu0 %v4009_v25 }
 0x130   : > { %2119 = vmatmul.mubr.msk.f32.gmra.mrb[20].mxu1 %vm1078_vm1, %v3628_v33 }
 0x131   : > { %1534 = vmatprep.mubr.f32.mxu1 %v4009_v25 }
 0x132   : > { %2111 = vmatmul.mubr.msk.f32.gmra.mrb[22].mxu0 %vm1078_vm1, %v1033_v19 }
 0x133   : > { %1433 = vmatprep.mubr.f32.mxu0 %v4009_v25 }
 0x134   : > { %2120 = vmatmul.mubr.msk.f32.gmra.mrb[22].mxu1 %vm1078_vm1, %v1033_v19 }
 0x135   : > { %1540 = vmatprep.mubr.f32.mxu1 %v4009_v25 }
 0x136   : > { %2112 = vmatmul.mubr.msk.f32.gmra.mrb[24].mxu0 %vm1078_vm1, %v1034_v44 }
 0x137   : > { %1439 = vmatprep.mubr.f32.mxu0 %v4009_v25 }
 0x138   : > { %2121 = vmatmul.mubr.msk.f32.gmra.mrb[24].mxu1 %vm1078_vm1, %v1034_v44 }
 0x139   : > { %1546 = vmatprep.mubr.f32.mxu1 %v4009_v25  ;;  %v3701_v40 = vpop.permute.xlu1 %1045 }
 0x13a   : > { %2113 = vmatmul.mubr.msk.f32.gmra.mrb[26].mxu0 %vm1078_vm1, %v1035_v60 }
 0x13b   : > { %1711 = vmatprep.mubr.f32.mxu0 %v4009_v25 }
 0x13c   : > { %2122 = vmatmul.mubr.msk.f32.gmra.mrb[26].mxu1 %vm1078_vm1, %v1035_v60 }
 0x13d   : > { %1782 = vmatprep.mubr.f32.mxu1 %v4009_v25 }
 0x13f   : > { %v3711_v5 = vpop.permute.xlu1 %1055 }
 0x144   : > { %v3722_v31 = vpop.permute.xlu1 %1065 }
 0x1d9   : > { %v1191_v1 = vpop.f32.mrb[0].mxu0 }
 0x1da   : > { %v1193_v13 = vpop.f32.mrb[1].mxu0  ;;  %v1192_v35 = vadd.f32 %v1191_v1, %v3701_v40  ;;  %v3734_v1 = vpop.permute.xlu1 %1075 }
 0x1db   : > { %v1298_v10 = vpop.f32.mrb[0].mxu1  ;;  %v1194_v52 = vadd.f32 %v1193_v13, %v3701_v40 }
 0x1dc   : > { %v1300_v30 = vpop.f32.mrb[1].mxu1  ;;  %2409 = vtanh.f32 %v1192_v35  ;;  %v1299_v57 = vadd.f32 %v1298_v10, %v3701_v40 }
 0x1dd   : > { %2411 = vtanh.f32 %v1194_v52  ;;  %v1301_v21 = vadd.f32 %v1300_v30, %v3701_v40  ;;  %v1197_v42 = vpop.f32.mrb[2].mxu0 }
 0x1de   : > { %v1198_v4 = vadd.f32 %v1197_v42, %v3706_v23  ;;  %v1199_v47 = vpop.f32.mrb[3].mxu0  ;;  %2413 = vtanh.f32 %v1299_v57 }
 0x1df   : > { %2415 = vtanh.f32 %v1301_v21  ;;  %v1304_v16 = vpop.f32.mrb[2].mxu1  ;;  %v1200_v39 = vadd.f32 %v1199_v47, %v3706_v23 }
 0x1e0   : > { %2417 = vtanh.f32 %v1198_v4  ;;  %v1305_v49 = vadd.f32 %v1304_v16, %v3706_v23  ;;  %v1306_v7 = vpop.f32.mrb[3].mxu1 }
 0x1e1   : > { %2419 = vtanh.f32 %v1200_v39  ;;  %v1307_v55 = vadd.f32 %v1306_v7, %v3706_v23  ;;  %v1203_v54 = vpop.f32.mrb[4].mxu0 }
 0x1e2   : > { %2421 = vtanh.f32 %v1305_v49  ;;  %v1204_v46 = vadd.f32 %v1203_v54, %v3711_v5  ;;  %v1205_v43 = vpop.f32.mrb[5].mxu0 }
 0x1e3   : > { %2423 = vtanh.f32 %v1307_v55  ;;  %v1310_v48 = vpop.f32.mrb[4].mxu1  ;;  %v1206_v51 = vadd.f32 %v1205_v43, %v3711_v5 }
 0x1e4   : > { %2425 = vtanh.f32 %v1204_v46  ;;  %v1311_v12 = vadd.f32 %v1310_v48, %v3711_v5  ;;  %v1312_v29 = vpop.f32.mrb[5].mxu1 }
 0x1e5   : > { %2427 = vtanh.f32 %v1206_v51  ;;  %v1313_v56 = vadd.f32 %v1312_v29, %v3711_v5  ;;  %v1209_v27 = vpop.f32.mrb[6].mxu0 }
 0x1e6   : > { %v2410_v37 = vpop.eup %2409  ;;  %2429 = vtanh.f32 %v1311_v12  ;;  %v1210_v53 = vadd.f32 %v1209_v27, %v3718_v62  ;;  %v1211_v61 = vpop.f32.mrb[7].mxu0 }
 0x1e7   : > { %v2412_v36 = vpop.eup %2411  ;;  %2431 = vtanh.f32 %v1313_v56  ;;  %v1316_v15 = vpop.f32.mrb[6].mxu1  ;;  %v1212_v0 = vadd.f32 %v1211_v61, %v3718_v62 }
 0x1e8   : > { %v2414_v50 = vpop.eup %2413  ;;  %2433 = vtanh.f32 %v1210_v53  ;;  %v1317_v2 = vadd.f32 %v1316_v15, %v3718_v62  ;;  %v1318_v3 = vpop.f32.mrb[7].mxu1 }
 0x1e9   : > { %v2416_v34 = vpop.eup %2415  ;;  %2435 = vtanh.f32 %v1212_v0  ;;  %v1319_v33 = vadd.f32 %v1318_v3, %v3718_v62  ;;  %v1215_v41 = vpop.f32.mrb[8].mxu0 }
 0x1ea   : > { %v2418_v58 = vpop.eup %2417  ;;  %2437 = vtanh.f32 %v1317_v2  ;;  %v1216_v45 = vadd.f32 %v1215_v41, %v3722_v31  ;;  %v1217_v6 = vpop.f32.mrb[9].mxu0 }
 0x1eb   : > { %v2420_v11 = vpop.eup %2419  ;;  %2439 = vtanh.f32 %v1319_v33  ;;  %v1322_v63 = vpop.f32.mrb[8].mxu1  ;;  %v1218_v22 = vadd.f32 %v1217_v6, %v3722_v31  ;;  %v2191_v19 = vpack.c.bf16 %v2418_v58, %v2410_v37 }
 0x1ec   : > { %v2422_v9 = vpop.eup %2421  ;;  %2441 = vtanh.f32 %v1216_v45  ;;  %v1323_v26 = vadd.f32 %v1322_v63, %v3722_v31  ;;  %v1324_v59 = vpop.f32.mrb[9].mxu1  ;;  %v2189_v32 = vpack.c.bf16 %v2420_v11, %v2412_v36 }
 0x1ed   : > { %v2424_v38 = vpop.eup %2423  ;;  %2443 = vtanh.f32 %v1218_v22  ;;  %v1325_v44 = vadd.f32 %v1324_v59, %v3722_v31  ;;  %v1221_v18 = vpop.f32.mrb[10].mxu0  ;;  %v2203_v28 = vpack.c.bf16 %v2422_v9, %v2414_v50 }
 0x1ee   : > { %v2426_v17 = vpop.eup %2425  ;;  %2445 = vtanh.f32 %v1323_v26  ;;  %v1222_v24 = vadd.f32 %v1221_v18, %v3730_v20  ;;  %v1223_v60 = vpop.f32.mrb[11].mxu0  ;;  %2190 = vmatprep.subr.bf16.mxu0 %v2189_v32  ;;  %v2201_v14 = vpack.c.bf16 %v2424_v38, %v2416_v34 }
 0x1ef   : > { %v2428_v8 = vpop.eup %2427  ;;  %2447 = vtanh.f32 %v1325_v44  ;;  %v1328_v13 = vpop.f32.mrb[10].mxu1  ;;  %v1224_v35 = vadd.f32 %v1223_v60, %v3730_v20  ;;  %2192 = vmatpush1.bf16.msra.mxu0 %v2191_v19 }
 0x1f0   : > { %v2430_v10 = vpop.eup %2429  ;;  %2449 = vtanh.f32 %v1222_v24  ;;  %v1329_v52 = vadd.f32 %v1328_v13, %v3730_v20  ;;  %v1330_v30 = vpop.f32.mrb[11].mxu1  ;;  %2202 = vmatprep.subr.bf16.mxu1 %v2201_v14 }
 0x1f1   : > { %v2432_v57 = vpop.eup %2431  ;;  %2451 = vtanh.f32 %v1224_v35  ;;  %v1331_v21 = vadd.f32 %v1330_v30, %v3730_v20  ;;  %2204 = vmatpush1.bf16.msra.mxu1 %v2203_v28  ;;  %v1227_v42 = vpop.f32.mrb[12].mxu0 }
 0x1f2   : > { %v2434_v4 = vpop.eup %2433  ;;  %2453 = vtanh.f32 %v1329_v52  ;;  %v1228_v47 = vadd.f32 %v1227_v42, %v3734_v1  ;;  %v1229_v16 = vpop.f32.mrb[13].mxu0 }
 0x1f3   : > { %v2436_v39 = vpop.eup %2435  ;;  %2455 = vtanh.f32 %v1331_v21  ;;  %v1334_v49 = vpop.f32.mrb[12].mxu1  ;;  %v1230_v7 = vadd.f32 %v1229_v16, %v3734_v1  ;;  %v2195_v55 = vpack.c.bf16 %v2434_v4, %v2426_v17  ;;  %v3759_v21 = vld [vmem:[%s3850_s7] sm:$0x1] }
 0x1f4   : > { %v2438_v54 = vpop.eup %2437  ;;  %2457 = vtanh.f32 %v1228_v47  ;;  %v1335_v46 = vadd.f32 %v1334_v49, %v3734_v1  ;;  %v1336_v43 = vpop.f32.mrb[13].mxu1  ;;  %v2193_v48 = vpack.c.bf16 %v2436_v39, %v2428_v8 }
 0x1f5   : > { %v2440_v51 = vpop.eup %2439  ;;  %2459 = vtanh.f32 %v1230_v7  ;;  %v1337_v12 = vadd.f32 %v1336_v43, %v3734_v1  ;;  %v1405_v29 = vpop.f32.mrb[14].mxu0  ;;  %v2207_v56 = vpack.c.bf16 %v2438_v54, %v2430_v10 }
 0x1f6   : > { %v2442_v27 = vpop.eup %2441  ;;  %2461 = vtanh.f32 %v1335_v46  ;;  %v1406_v37 = vadd.f32 %v1405_v29, %v3701_v40  ;;  %v1407_v53 = vpop.f32.mrb[15].mxu0  ;;  %2194 = vmatprep.subr.bf16.mxu0 %v2193_v48  ;;  %v2205_v61 = vpack.c.bf16 %v2440_v51, %v2432_v57 }
 0x1f7   : > { %v2444_v36 = vpop.eup %2443  ;;  %2463 = vtanh.f32 %v1337_v12  ;;  %v1512_v15 = vpop.f32.mrb[14].mxu1  ;;  %v1408_v0 = vadd.f32 %v1407_v53, %v3701_v40  ;;  %2196 = vmatpush1.bf16.msra.mxu0 %v2195_v55 }
 0x1f8   : > { %v2446_v50 = vpop.eup %2445  ;;  %2465 = vtanh.f32 %v1406_v37  ;;  %v1513_v2 = vadd.f32 %v1512_v15, %v3701_v40  ;;  %v1514_v3 = vpop.f32.mrb[15].mxu1  ;;  %2206 = vmatprep.subr.bf16.mxu1 %v2205_v61 }
 0x1f9   : > { %v2448_v34 = vpop.eup %2447  ;;  %2467 = vtanh.f32 %v1408_v0  ;;  %v1515_v33 = vadd.f32 %v1514_v3, %v3701_v40  ;;  %2208 = vmatpush1.bf16.msra.mxu1 %v2207_v56  ;;  %v1411_v41 = vpop.f32.mrb[16].mxu0 }
 0x1fa   : > { %v2450_v58 = vpop.eup %2449  ;;  %2469 = vtanh.f32 %v1513_v2  ;;  %v1412_v45 = vadd.f32 %v1411_v41, %v3706_v23  ;;  %v1413_v6 = vpop.f32.mrb[17].mxu0 }
 0x1fb   : > { %v2452_v11 = vpop.eup %2451  ;;  %2471 = vtanh.f32 %v1515_v33  ;;  %v1518_v63 = vpop.f32.mrb[16].mxu1  ;;  %v1414_v22 = vadd.f32 %v1413_v6, %v3706_v23  ;;  %v2199_v19 = vpack.c.bf16 %v2450_v58, %v2442_v27 }
 0x1fc   : > { %v2454_v9 = vpop.eup %2453  ;;  %2473 = vtanh.f32 %v1412_v45  ;;  %v1519_v26 = vadd.f32 %v1518_v63, %v3706_v23  ;;  %v1520_v59 = vpop.f32.mrb[17].mxu1  ;;  %v2197_v32 = vpack.c.bf16 %v2452_v11, %v2444_v36 }
 0x1fd   : > { %v2456_v40 = vpop.eup %2455  ;;  %2475 = vtanh.f32 %v1414_v22  ;;  %v1521_v38 = vadd.f32 %v1520_v59, %v3706_v23  ;;  %v1417_v44 = vpop.f32.mrb[18].mxu0  ;;  %v2211_v18 = vpack.c.bf16 %v2454_v9, %v2446_v50 }
 0x1fe   : > { %v2458_v28 = vpop.eup %2457  ;;  %2477 = vtanh.f32 %v1519_v26  ;;  %v1418_v17 = vadd.f32 %v1417_v44, %v3711_v5  ;;  %v1419_v24 = vpop.f32.mrb[19].mxu0  ;;  %2198 = vmatprep.subr.bf16.mxu0 %v2197_v32  ;;  %v2209_v60 = vpack.c.bf16 %v2456_v40, %v2448_v34 }
 0x1ff   : > { %v2460_v14 = vpop.eup %2459  ;;  %2479 = vtanh.f32 %v1521_v38  ;;  %v1524_v8 = vpop.f32.mrb[18].mxu1  ;;  %v1420_v13 = vadd.f32 %v1419_v24, %v3711_v5  ;;  %2200 = vmatpush1.bf16.msra.mxu0 %v2199_v19 }
 0x200   : > { %v2462_v35 = vpop.eup %2461  ;;  %2481 = vtanh.f32 %v1418_v17  ;;  %v1525_v10 = vadd.f32 %v1524_v8, %v3711_v5  ;;  %v1526_v23 = vpop.f32.mrb[19].mxu1  ;;  %2210 = vmatprep.subr.bf16.mxu1 %v2209_v60  ;;  %2123 = vmatprep.subr.msk.mxu0 %vm1100_vm0, %v2460_v14 }
 0x201   : > { %v2464_v52 = vpop.eup %2463  ;;  %2483 = vtanh.f32 %v1420_v13  ;;  %v1527_v30 = vadd.f32 %v1526_v23, %v3711_v5  ;;  %2212 = vmatpush1.bf16.msra.mxu1 %v2211_v18  ;;  %v1423_v57 = vpop.f32.mrb[20].mxu0 }
 0x202   : > { %v2466_v42 = vpop.eup %2465  ;;  %2485 = vtanh.f32 %v1525_v10  ;;  %2126 = vmatprep.subr.msk.mxu1 %vm1100_vm0, %v2464_v52  ;;  %v1424_v4 = vadd.f32 %v1423_v57, %v3718_v62  ;;  %v1425_v47 = vpop.f32.mrb[21].mxu0 }
 0x203   : > { %v2468_v16 = vpop.eup %2467  ;;  %2487 = vtanh.f32 %v1527_v30  ;;  %v1530_v39 = vpop.f32.mrb[20].mxu1  ;;  %v1426_v49 = vadd.f32 %v1425_v47, %v3718_v62  ;;  %2124 = vmatpush1.msk.msra.mxu0 %vm1100_vm0, %v2458_v28 }
 0x204   : > { %v2470_v5 = vpop.eup %2469  ;;  %2489 = vtanh.f32 %v1424_v4  ;;  %v1531_v7 = vadd.f32 %v1530_v39, %v3718_v62  ;;  %v1532_v55 = vpop.f32.mrb[21].mxu1  ;;  %2125 = vmatmul.mubr.msk.f32.vlgmr.msra.gmra.mrb[28].mxu0 %vm1078_vm1, %v3759_v21 }
 0x205   : > { %v2472_v54 = vpop.eup %2471  ;;  %2491 = vtanh.f32 %v1426_v49  ;;  %v1533_v46 = vadd.f32 %v1532_v55, %v3718_v62  ;;  %2127 = vmatpush1.msk.msra.mxu1 %vm1100_vm0, %v2462_v35  ;;  %v1429_v43 = vpop.f32.mrb[22].mxu0  ;;  %1853 = vmatprep.mubr.f32.mxu0 %v4009_v25  ;;  %v2589_v55 = vmov 1966171168  }
 0x206   : > { %v2474_v48 = vpop.eup %2473  ;;  %2493 = vtanh.f32 %v1531_v7  ;;  %2128 = vmatmul.mubr.msk.f32.vlgmr.msra.gmra.mrb[28].mxu1 %vm1078_vm1, %v3759_v21  ;;  %v1430_v51 = vadd.f32 %v1429_v43, %v3722_v31  ;;  %v1431_v12 = vpop.f32.mrb[23].mxu0 }
 0x207   : > { %v2476_v29 = vpop.eup %2475  ;;  %2495 = vtanh.f32 %v1533_v46  ;;  %v1536_v56 = vpop.f32.mrb[22].mxu1  ;;  %v1432_v27 = vadd.f32 %v1431_v12, %v3722_v31  ;;  %v2215_v37 = vpack.c.bf16 %v2474_v48, %v2466_v42  ;;  %1924 = vmatprep.mubr.f32.mxu1 %v4009_v25  ;;  %v4012_v48 = vld [vmem:[#allocation7_spill] sm:$0xff] }
 0x208   : > { %v2478_v62 = vpop.eup %2477  ;;  %2497 = vtanh.f32 %v1430_v51  ;;  %v1537_v53 = vadd.f32 %v1536_v56, %v3722_v31  ;;  %v1538_v61 = vpop.f32.mrb[23].mxu1  ;;  %v2213_v36 = vpack.c.bf16 %v2476_v29, %v2468_v16 }
 0x209   : > { %v2480_v15 = vpop.eup %2479  ;;  %2499 = vtanh.f32 %v1432_v27  ;;  %v1539_v0 = vadd.f32 %v1538_v61, %v3722_v31  ;;  %v1435_v50 = vpop.f32.mrb[24].mxu0  ;;  %v2227_v2 = vpack.c.bf16 %v2478_v62, %v2470_v5  ;;  %v4013_v62 = vld [vmem:[#allocation6_spill] sm:$0xff] }
 0x20a   : > { %v2482_v3 = vpop.eup %2481  ;;  %2501 = vtanh.f32 %v1537_v53  ;;  %v1436_v34 = vadd.f32 %v1435_v50, %v3730_v20  ;;  %v1437_v33 = vpop.f32.mrb[25].mxu0  ;;  %2214 = vmatprep.subr.bf16.mxu0 %v2213_v36  ;;  %v2225_v41 = vpack.c.bf16 %v2480_v15, %v2472_v54  ;;  %v1944_v54 = vunpack.c.l.s4 %v2589_v55 }
 0x20b   : > { %v2484_v25 = vpop.eup %2483  ;;  %2503 = vtanh.f32 %v1539_v0  ;;  %v1542_v58 = vpop.f32.mrb[24].mxu1  ;;  %v1438_v45 = vadd.f32 %v1437_v33, %v3730_v20  ;;  %2216 = vmatpush1.bf16.msra.mxu0 %v2215_v37 }
 0x20c   : > { %v2486_v6 = vpop.eup %2485  ;;  %2505 = vtanh.f32 %v1436_v34  ;;  %v1543_v11 = vadd.f32 %v1542_v58, %v3730_v20  ;;  %v1544_v31 = vpop.f32.mrb[25].mxu1  ;;  %2226 = vmatprep.subr.bf16.mxu1 %v2225_v41  ;;  %v1945_v43 = vunpack.c.0.s8 %v1944_v54 }
 0x20d   : > { %v2488_v63 = vpop.eup %2487  ;;  %2507 = vtanh.f32 %v1438_v45  ;;  %v1545_v22 = vadd.f32 %v1544_v31, %v3730_v20  ;;  %2228 = vmatpush1.bf16.msra.mxu1 %v2227_v2  ;;  %v1441_v19 = vpop.f32.mrb[26].mxu0 }
 0x20e   : > { %v2490_v9 = vpop.eup %2489  ;;  %2509 = vtanh.f32 %v1543_v11  ;;  %v1443_v26 = vpop.f32.mrb[27].mxu0  ;;  %v1442_v18 = vadd.f32 %v1441_v19, %v3734_v1  ;;  %v1948_v53 = vsub.s32 %v1945_v43, %v4013_v62 }
 0x20f   : > { %v2492_v59 = vpop.eup %2491  ;;  %2511 = vtanh.f32 %v1545_v22  ;;  %v1548_v32 = vpop.f32.mrb[26].mxu1  ;;  %v1444_v40 = vadd.f32 %v1443_v26, %v3734_v1  ;;  %v2219_v38 = vpack.c.bf16 %v2490_v9, %v2482_v3 }
 0x210   : > { %v2494_v44 = vpop.eup %2493  ;;  %v1550_v28 = vpop.f32.mrb[27].mxu1  ;;  %v2217_v17 = vpack.c.bf16 %v2492_v59, %v2484_v25  ;;  %v1549_v8 = vadd.f32 %v1548_v32, %v3734_v1 }
 0x211   : > { %v2496_v24 = vpop.eup %2495  ;;  %2513 = vtanh.f32 %v1444_v40  ;;  %v1551_v20 = vadd.f32 %v1550_v28, %v3734_v1  ;;  %v2231_v60 = vpack.c.bf16 %v2494_v44, %v2486_v6  ;;  %v1614_v46 = vpop.permute.xlu0 %1613 }
 0x212   : > { %v2498_v14 = vpop.eup %2497  ;;  %2218 = vmatprep.subr.bf16.mxu0 %v2217_v17  ;;  %v2229_v13 = vpack.c.bf16 %v2496_v24, %v2488_v63  ;;  %v1619_v51 = vrot.slane %v1614_v46, %v4012_v48 }
 0x213   : > { %v2500_v35 = vpop.eup %2499  ;;  %2515 = vtanh.f32 %v1551_v20  ;;  %2220 = vmatpush1.bf16.msra.mxu0 %v2219_v38 }
 0x214   : > { %v2502_v10 = vpop.eup %2501  ;;  %2517 = vtanh.f32 %v1442_v18  ;;  %2230 = vmatprep.subr.bf16.mxu1 %v2229_v13 }
 0x215   : > { %v2504_v23 = vpop.eup %2503  ;;  %2232 = vmatpush1.bf16.msra.mxu1 %v2231_v60  ;;  %2519 = vtanh.f32 %v1549_v8 }
 0x216   : > { %v2506_v52 = vpop.eup %2505 }
 0x217   : > { %v2508_v30 = vpop.eup %2507  ;;  %v2223_v57 = vpack.c.bf16 %v2506_v52, %v2498_v14 }
 0x218   : > { %v2510_v42 = vpop.eup %2509  ;;  %v2221_v4 = vpack.c.bf16 %v2508_v30, %v2500_v35 }
 0x219   : > { %v2512_v47 = vpop.eup %2511  ;;  %v2235_v16 = vpack.c.bf16 %v2510_v42, %v2502_v10 }
 0x21a   : > { %2222 = vmatprep.subr.bf16.mxu0 %v2221_v4  ;;  %v2233_v1 = vpack.c.bf16 %v2512_v47, %v2504_v23 }
 0x21b   : > { %v2514_v39 = vpop.eup %2513  ;;  %2224 = vmatpush1.bf16.msra.mxu0 %v2223_v57 }
 0x21c   : > { %2234 = vmatprep.subr.bf16.mxu1 %v2233_v1  ;;  %2129 = vmatprep.subr.msk.mxu0 %vm1100_vm0, %v2514_v39 }
 0x21d   : > { %v2516_v49 = vpop.eup %2515  ;;  %2236 = vmatpush1.bf16.msra.mxu1 %v2235_v16 }
 0x21e   : > { %v2518_v5 = vpop.eup %2517  ;;  %2132 = vmatprep.subr.msk.mxu1 %vm1100_vm0, %v2516_v49 }
 0x21f   : > { %2130 = vmatpush1.msk.msra.mxu0 %vm1100_vm0, %v2518_v5  ;;  %v2520_v7 = vpop.eup %2519 }
 0x220   : > { %2131 = vmatmul.mubr.msk.f32.vlgmr.msra.gmra.mrb[30].mxu0 %vm1078_vm1, %v3759_v21 }
 0x221   : > { %2133 = vmatpush1.msk.msra.mxu1 %vm1100_vm0, %v2520_v7 }
 0x222   : > { %2134 = vmatmul.mubr.msk.f32.vlgmr.msra.gmra.mrb[30].mxu1 %vm1078_vm1, %v3759_v21 }
 0x2d7   : > { %v1713_v12 = vpop.f32.mrb[28].mxu0 }
 0x2d8   : > { %v1714_v29 = vadd.f32 %v1713_v12, %v1619_v51  ;;  %v1715_v56 = vpop.f32.mrb[29].mxu0 }
 0x2d9   : > { %v1784_v27 = vpop.f32.mrb[28].mxu1  ;;  %v1716_v37 = vadd.f32 %v1715_v56, %v1619_v51 }
 0x2da   : > { %v1785_v61 = vadd.f32 %v1784_v27, %v1619_v51  ;;  %v1786_v36 = vpop.f32.mrb[29].mxu1 }
 0x2db   : > { %v1939_v15 = vcombine.low %v1714_v29, %v1716_v37  ;;  %v1787_v0 = vadd.f32 %v1786_v36, %v1619_v51 }
 0x2dd   : > { %v1949_v50 = vrot.slane %v1939_v15, %v1948_v53  ;;  %v1940_v21 = vcombine.low %v1785_v61, %v1787_v0 }
 0x2df   : > { %v1956_v2 = vrot.slane %v1940_v21, %v1948_v53 }
 0x2e1   : > { %v1971_v3 = vcombine.low %v1949_v50, %v1956_v2 }
 0x2e3   : > { %v1979_v26 = vrot.slane %v1971_v3, %v1948_v53 }
 0x2f3   : > { %v1855_v34 = vpop.f32.mrb[30].mxu0 }
 0x2f4   : > { %v1856_v33 = vadd.f32 %v1855_v34, %v1619_v51  ;;  %v1857_v41 = vpop.f32.mrb[31].mxu0 }
 0x2f5   : > { %v1926_v25 = vpop.f32.mrb[30].mxu1  ;;  %v1858_v58 = vadd.f32 %v1857_v41, %v1619_v51 }
 0x2f6   : > { %v1927_v45 = vadd.f32 %v1926_v25, %v1619_v51  ;;  %v1928_v6 = vpop.f32.mrb[31].mxu1 }
 0x2f7   : > { %v1941_v11 = vcombine.low %v1856_v33, %v1858_v58  ;;  %v1929_v31 = vadd.f32 %v1928_v6, %v1619_v51 }
 0x2f9   : > { %v1963_v63 = vrot.slane %v1941_v11, %v1948_v53  ;;  %v1942_v22 = vcombine.low %v1927_v45, %v1929_v31 }
 0x2fb   : > { %v1970_v19 = vrot.slane %v1942_v22, %v1948_v53 }
 0x2fd   : > { %v1972_v9 = vcombine.low %v1963_v63, %v1970_v19 }
 0x2ff   : > { %v1986_v59 = vrot.slane %v1972_v9, %v1948_v53 }
 0x301   : > { %v1987_v32 = vcombine.low %v1979_v26, %v1986_v59 }
 0x303   : > { %1989 = vst [vmem:[%s354_s28] sm:$0xff] %v1987_v32 }
 0x304   : > { %2534 = shalt.err (!%p2531_p3)
}
 0x305   : > { %s2535_s24 = scalar_lea.hbm %s3801_s15, 128  ;;  %s2539_s27 = scalar_lea.hbm %s3852_s9, 256 }
 0x306   : > { %p2536_p4 = scmp.ne.s32.totalorder %s3801_s15, %s2535_s24  ;;  %p2540_p9 = scmp.lt.u32.totalorder %s3801_s15, %s3852_s9 }
 0x307   : > { %p2541_p10 = scmp.lt.u32.totalorder %s2539_s27, %s2535_s24  ;;  %p2543_p12 = scmp.lt.u32.totalorder %s2535_s24, %s3801_s15 }
 0x308   : > { %p2537_p7 = pnand %p2536_p4, %p2682_p5 }
 0x309   : > { %p2542_p11 = por %p2541_p10, %p2540_p9 }
 0x30a   : > { %p2538_p8 = pneg %p2537_p7 }
 0x30b   : > { %p2544_p13 = por %p2543_p12, %p2542_p11 }
 0x30d   : > { %p2545_p0 = pnand %p2544_p13, %p2538_p8 }
 0x30f   : > { %2548 = shalt.err (!%p2545_p0)
}
 0x310   : > { %2237 = dma.vmem_to_hbm [thread:$0]  (%p2682_p5), %s3803_s29, 128, %s3801_s15, %s1991_s17  }
 0x311 PF: > { %p2243_p1 = scmp.ge.s32.totalorder %s2583_s14, 2  ;;  %s2017_s10 = sand.u32 1, %s2571_s11  }
 0x312   : > { %s2018_s18 = scalar_lea.sflag [#allocation4], %s2017_s10 }
 0x313   : > { %p2240_p2 = pnand %p2243_p1, %p2686_p6 }
 0x315   : > { %2566 = dma.done.wait (!%p2240_p2), %s2018_s18, 128  }
 0x316   : > { %2568 = vsyncadd (!%p2240_p2), %s2018_s18, 4294967168  ;;  %p21_p3 = scmp.ge.s32.totalorder %s2669_s16, 4   ;;  %s4014_s11 = smov %s2575_s12 }
 0x317   : > { %s4015_s12 = smov %s2579_s13  ;;  %s4016_s13 = smov %s2680_s19 }
 0x318   : > { %s4017_s14 = smov %s2669_s16  ;;  %23 = sbr.rel (!%p21_p3) target bundleno = 6 (0x6), region = 97 }
 0x31f   :  { %2023 = vsyncpa [#allocation4], 1 }
 0x320   :  { %2025 = vsyncpa [#allocation4 + $0x1], 1 }

</bundles_post_ra>
